<compile_context>
chip_gen: v6e
topology: v6e:2x2x1
jax: 0.10.0
libtpu: 0.0.40
codegen_flags: <defaults>
</compile_context>

<pallas_src>
import functools
import math

import jax
import jax.numpy as jnp
from jax.experimental import pallas as pl
from jax.experimental.pallas import tpu as pltpu

LANE = 128
VMEM_LIMIT = 32 * 1024 * 1024  # safe on v5e(128M)/v6e(128M)/v7x(64M); usage is ~2 MiB


def _round_up(v, m):
    return (v + m - 1) // m * m


# ---------------------------------------------------------------- kernels ----
def _conv_kernel(adj_ref, x_ref, wT_ref, o_ref, acc_ref):
    """out[i] = relu((sum_k adj[i,k] @ x[k]) @ W^T)  ==  relu(adj @ (x @ W^T))."""
    k = pl.program_id(1)
    nk = pl.num_programs(1)

    @pl.when(k == 0)
    def _():
        acc_ref[...] = jnp.zeros_like(acc_ref)

    acc_ref[...] += jnp.dot(adj_ref[...], x_ref[...],
                            preferred_element_type=jnp.float32)

    @pl.when(k == nk - 1)
    def _():
        h = jnp.dot(acc_ref[...].astype(wT_ref.dtype), wT_ref[...],
                    preferred_element_type=jnp.float32)
        o_ref[...] = jnp.maximum(h, 0.0).astype(o_ref.dtype)


def _conv_head_kernel(adj_ref, x_ref, w2T_ref, w3T_ref, b_ref, o_ref, acc_ref,
                      *, n_valid):
    """Conv layer 2 fused with the MLP head + masked log_softmax epilogue."""
    k = pl.program_id(1)
    nk = pl.num_programs(1)

    @pl.when(k == 0)
    def _():
        acc_ref[...] = jnp.zeros_like(acc_ref)

    acc_ref[...] += jnp.dot(adj_ref[...], x_ref[...],
                            preferred_element_type=jnp.float32)

    @pl.when(k == nk - 1)
    def _():
        h2 = jnp.dot(acc_ref[...].astype(w2T_ref.dtype), w2T_ref[...],
                     preferred_element_type=jnp.float32)
        h2 = jnp.maximum(h2, 0.0)
        logits = jnp.dot(h2.astype(w3T_ref.dtype), w3T_ref[...],
                         preferred_element_type=jnp.float32) + b_ref[...]
        # masked log_softmax over the first n_valid (un-padded) output columns
        col = jax.lax.broadcasted_iota(jnp.int32, logits.shape, 1)
        valid = col < n_valid
        masked = jnp.where(valid, logits, jnp.float32(-1e30))
        m = jnp.max(masked, axis=-1, keepdims=True)
        e = jnp.where(valid, jnp.exp(masked - m), 0.0)
        lse = jnp.log(jnp.sum(e, axis=-1, keepdims=True))
        o_ref[...] = (masked - m - lse).astype(o_ref.dtype)


# --------------------------------------------------------------- wrappers ----
def gcn_conv(adj_b, x_b, wT_b, *, tm, tk, out_dtype=jnp.bfloat16):
    """relu(adj @ (x @ W^T)) via the (adj @ x) @ W^T reorder; all inputs bf16."""
    n = adj_b.shape[0]
    dxp = x_b.shape[1]
    dout = wT_b.shape[1]
    assert n % tm == 0 and n % tk == 0, "caller must pad the node count"

    cost = pl.CostEstimate(
        flops=2 * n * n * dxp + 2 * n * dxp * dout,
        transcendentals=0,
        bytes_accessed=(adj_b.size * 2 + (n // tm) * x_b.size * 2
                        + wT_b.size * 2 + n * dout * jnp.dtype(out_dtype).itemsize),
    )

    return pl.pallas_call(
        _conv_kernel,
        out_shape=jax.ShapeDtypeStruct((n, dout), out_dtype),
        grid_spec=pltpu.PrefetchScalarGridSpec(
            num_scalar_prefetch=0,
            grid=(n // tm, n // tk),
            in_specs=[
                pl.BlockSpec((tm, tk), lambda i, k: (i, k)),      # adj tile
                pl.BlockSpec((tk, dxp), lambda i, k: (k, 0)),     # x tile (per k)
                pl.BlockSpec((dxp, dout), lambda i, k: (0, 0)),   # W^T (resident)
            ],
            out_specs=pl.BlockSpec((tm, dout), lambda i, k: (i, 0)),
            scratch_shapes=[pltpu.VMEM((tm, dxp), jnp.float32)],  # K accumulator
        ),
        compiler_params=pltpu.CompilerParams(
            dimension_semantics=("parallel", "arbitrary"),
            vmem_limit_bytes=VMEM_LIMIT),
        cost_estimate=cost,
    )(adj_b, x_b, wT_b)


def gcn_conv_head(adj_b, x_b, w2T_b, w3T_b, b_pad, n_valid, *, tm, tk):
    """relu(adj @ (x @ W2^T)) -> @ W3^T + b -> masked log_softmax, all in one kernel."""
    n = adj_b.shape[0]
    hp = x_b.shape[1]
    cp = w3T_b.shape[1]
    assert n % tm == 0 and n % tk == 0

    cost = pl.CostEstimate(
        flops=2 * n * n * hp + 2 * n * hp * hp + 2 * n * hp * cp + 6 * n * cp,
        transcendentals=n * cp + n,
        bytes_accessed=(adj_b.size * 2 + (n // tm) * x_b.size * 2
                        + (w2T_b.size + w3T_b.size) * 2 + n * cp * 4),
    )

    return pl.pallas_call(
        functools.partial(_conv_head_kernel, n_valid=n_valid),
        out_shape=jax.ShapeDtypeStruct((n, cp), jnp.float32),
        grid_spec=pltpu.PrefetchScalarGridSpec(
            num_scalar_prefetch=0,
            grid=(n // tm, n // tk),
            in_specs=[
                pl.BlockSpec((tm, tk), lambda i, k: (i, k)),      # adj tile
                pl.BlockSpec((tk, hp), lambda i, k: (k, 0)),      # h1 tile (per k)
                pl.BlockSpec((hp, hp), lambda i, k: (0, 0)),      # W2^T (resident)
                pl.BlockSpec((hp, cp), lambda i, k: (0, 0)),      # W3^T (resident)
                pl.BlockSpec((1, cp), lambda i, k: (0, 0)),       # b3   (resident)
            ],
            out_specs=pl.BlockSpec((tm, cp), lambda i, k: (i, 0)),
            scratch_shapes=[pltpu.VMEM((tm, hp), jnp.float32)],   # K accumulator
        ),
        compiler_params=pltpu.CompilerParams(
            dimension_semantics=("parallel", "arbitrary"),
            vmem_limit_bytes=VMEM_LIMIT),
        cost_estimate=cost,
    )(adj_b, x_b, w2T_b, w3T_b, b_pad)


def gcn_forward(x, adj, w1, w2, w3, b3, *, tm=None, tk=None):
    """Full GCN.forward (inference)."""
    n, in_ch = x.shape
    hidden = w1.shape[0]
    out_ch = w3.shape[0]

    dip = _round_up(in_ch, LANE)
    hp = _round_up(hidden, LANE)
    cp = _round_up(out_ch, LANE)

    # Tile choice: big tiles for HBM roofline / per-step overhead, clamped to the
    # (padded) graph size so tiny graphs don't over-pad.  (Use 512 on large graphs.)
    if tm is None and tk is None:
        tm = tk = min(512, _round_up(n, 256))
    tm = tm or tk
    tk = tk or tm
    n_pad = _round_up(n, math.lcm(tm, tk))

    # bf16 adjacency (halves the dominant HBM stream); cast BEFORE padding.
    # TODO(synk): on v7x an fp8 (e4m3) adjacency would halve this stream again.
    adj_b = adj.astype(jnp.bfloat16)
    if n_pad != n:
        adj_b = jnp.pad(adj_b, ((0, n_pad - n), (0, n_pad - n)))

    # bf16 node features, row-padded to n_pad and lane-padded to a 128 multiple.
    x_b = jnp.pad(x.astype(jnp.bfloat16), ((0, n_pad - n), (0, dip - in_ch)))

    # Weights: transpose + lane-pad once outside the kernels; bf16 for the MXU.
    # Zero-padded rows/columns keep the padded feature lanes exactly zero end-to-end.
    w1T = jnp.pad(w1.T, ((0, dip - in_ch), (0, hp - hidden))).astype(jnp.bfloat16)
    w2T = jnp.pad(w2.T, ((0, hp - hidden), (0, hp - hidden))).astype(jnp.bfloat16)
    w3T = jnp.pad(w3.T, ((0, hp - hidden), (0, cp - out_ch))).astype(jnp.bfloat16)
    b3p = jnp.pad(b3, (0, cp - out_ch)).reshape(1, cp).astype(jnp.float32)

    h1 = gcn_conv(adj_b, x_b, w1T, tm=tm, tk=tk)                 # (n_pad, hp) bf16
    # TODO(synk): F.dropout(p=0.5) is identity at inference; training-mode dropout
    # would use pltpu.prng_seed / pltpu.prng_random_bits inside the conv kernel.
    out = gcn_conv_head(adj_b, h1, w2T, w3T, b3p, out_ch, tm=tm, tk=tk)  # (n_pad, cp)
    return out[:n, :out_ch]


# -------------------------------------------------------------- init glue ----
def orthogonal_init(key, out_dim, in_dim, gain):
    """Deterministic orthogonal init (matches nn.init.orthogonal_ semantics)."""
    a = jax.random.normal(key, (max(out_dim, in_dim), min(out_dim, in_dim)),
                          dtype=jnp.float32)
    q, r = jnp.linalg.qr(a)
    d = jnp.diagonal(r)
    q = q * jnp.where(d >= 0, 1.0, -1.0)   # make the decomposition unique
    if out_dim < in_dim:
        q = q.T
    return gain * q[:out_dim, :in_dim]


# ------------------------------------------------------------------- main ----
if __name__ == "__main__":
    N = 256          # graph nodes
    IN_CH = 64
    HIDDEN = 32
    OUT_CH = 8

    key = jax.random.PRNGKey(0)
    kx, kadj, k1, k2, k3, kb = jax.random.split(key, 6)

    # node features
    x = jax.random.normal(kx, (N, IN_CH), dtype=jnp.float32)

    # dense, row-normalized random adjacency with self loops
    adj_raw = (jax.random.uniform(kadj, (N, N)) > 0.9).astype(jnp.float32)
    adj_raw = adj_raw + jnp.eye(N, dtype=jnp.float32)
    adj = adj_raw / jnp.sum(adj_raw, axis=1, keepdims=True)

    # ConvClass weights: orthogonal, gain = 1/sqrt(input_dim)
    w1 = orthogonal_init(k1, HIDDEN, IN_CH, 1.0 / float(IN_CH) ** 0.5)
    w2 = orthogonal_init(k2, HIDDEN, HIDDEN, 1.0 / float(HIDDEN) ** 0.5)

    # MLPClassifier (nn.Linear) weights
    lim = 1.0 / float(HIDDEN) ** 0.5
    w3 = jax.random.uniform(k3, (OUT_CH, HIDDEN), minval=-lim, maxval=lim,
                            dtype=jnp.float32)
    b3 = jax.random.uniform(kb, (OUT_CH,), minval=-lim, maxval=lim,
                            dtype=jnp.float32)

    out = jax.jit(gcn_forward)(x, adj, w1, w2, w3, b3)
    out = jax.block_until_ready(out)

    # Pure-f32 reference faithful to the PyTorch module (inference).
    def ref_gcn(x, adj, w1, w2, w3, b3):
        h1 = jnp.maximum(adj @ (x @ w1.T), 0.0)
        h2 = jnp.maximum(adj @ (h1 @ w2.T), 0.0)
        logits = h2 @ w3.T + b3
        return jax.nn.log_softmax(logits, axis=1)

    ref = ref_gcn(x, adj, w1, w2, w3, b3)

    assert out.shape == (N, OUT_CH)
    assert bool(jnp.all(jnp.isfinite(out))), "non-finite values in kernel output"
    max_diff = float(jnp.max(jnp.abs(out - ref)))
    assert jnp.allclose(out, ref, atol=2e-2, rtol=2e-2), f"max abs diff {max_diff}"

    print("KERNEL_OK")
</pallas_src>

<mosaic_0001>
module attributes {stable_mosaic.version = 11 : i64} {
  func.func @_conv_kernel(%arg0: i32, %arg1: i32, %arg2: memref<256x256xbf16, #tpu.memory_space<vmem>>, %arg3: memref<256x128xbf16, #tpu.memory_space<vmem>>, %arg4: memref<128x128xbf16, #tpu.memory_space<vmem>>, %arg5: memref<256x128xbf16, #tpu.memory_space<vmem>>, %arg6: memref<256x128xf32, #tpu.memory_space<vmem>>) attributes {dimension_semantics = [#tpu.dimension_semantics<parallel>, #tpu.dimension_semantics<arbitrary>], iteration_bounds = array<i64: 1, 1>, scalar_prefetch = 0 : i64, scratch_operands = 1 : i64, tpu.core_type = #tpu.core_type<tc>, window_params = [{transform_indices = @transform_0, window_bounds = array<i64: 256, 256>}, {transform_indices = @transform_1, window_bounds = array<i64: 256, 128>}, {pipeline_mode = #tpu.pipeline_mode<synchronous>, transform_indices = @transform_2, window_bounds = array<i64: 128, 128>}, {transform_indices = @transform_3, window_bounds = array<i64: 256, 128>}]} {
    %c0_i32 = arith.constant 0 : i32
    %0 = arith.cmpi eq, %arg1, %c0_i32 : i32
    %1 = arith.extui %0 : i1 to i32
    %c0_i32_0 = arith.constant 0 : i32
    %2 = arith.cmpi ne, %1, %c0_i32_0 : i32
    scf.if %2 {
      %cst_10 = arith.constant 0.000000e+00 : f32
      %12 = vector.broadcast %cst_10 : f32 to vector<256x128xf32>
      %c0_11 = arith.constant 0 : index
      %c0_12 = arith.constant 0 : index
      %13 = vector.load %arg6[%c0_11, %c0_12] : memref<256x128xf32, #tpu.memory_space<vmem>>, vector<256x128xf32>
      tpu.vector_store %arg6[%c0_11, %c0_12], %12 {strides = array<i32>} : memref<256x128xf32, #tpu.memory_space<vmem>>, vector<256x128xf32>,
    } else {
    }
    %c0 = arith.constant 0 : index
    %c0_1 = arith.constant 0 : index
    %3 = vector.load %arg6[%c0, %c0_1] : memref<256x128xf32, #tpu.memory_space<vmem>>, vector<256x128xf32>
    %c0_2 = arith.constant 0 : index
    %c0_3 = arith.constant 0 : index
    %4 = vector.load %arg2[%c0_2, %c0_3] : memref<256x256xbf16, #tpu.memory_space<vmem>>, vector<256x256xbf16>
    %c0_4 = arith.constant 0 : index
    %c0_5 = arith.constant 0 : index
    %5 = vector.load %arg3[%c0_4, %c0_5] : memref<256x128xbf16, #tpu.memory_space<vmem>>, vector<256x128xbf16>
    %cst = arith.constant dense<0.000000e+00> : vector<256x128xf32>
    %6 = tpu.matmul %4, %5, %cst {dimension_numbers = #tpu.dot_dimension_numbers<[1], [0], [0], [1], [0, 0, 1, 1], [], []>} : vector<256x256xbf16>, vector<256x128xbf16>, vector<256x128xf32> -> vector<256x128xf32>
    %7 = arith.addf %3, %6 : vector<256x128xf32>
    %c0_6 = arith.constant 0 : index
    %c0_7 = arith.constant 0 : index
    %8 = vector.load %arg6[%c0_6, %c0_7] : memref<256x128xf32, #tpu.memory_space<vmem>>, vector<256x128xf32>
    tpu.vector_store %arg6[%c0_6, %c0_7], %7 {strides = array<i32>} : memref<256x128xf32, #tpu.memory_space<vmem>>, vector<256x128xf32>,
    %c0_i32_8 = arith.constant 0 : i32
    %9 = arith.cmpi eq, %arg1, %c0_i32_8 : i32
    %10 = arith.extui %9 : i1 to i32
    %c0_i32_9 = arith.constant 0 : i32
    %11 = arith.cmpi ne, %10, %c0_i32_9 : i32
    scf.if %11 {
      %c0_10 = arith.constant 0 : index
      %c0_11 = arith.constant 0 : index
      %12 = vector.load %arg6[%c0_10, %c0_11] : memref<256x128xf32, #tpu.memory_space<vmem>>, vector<256x128xf32>
      %13 = arith.truncf %12 : vector<256x128xf32> to vector<256x128xbf16>
      %c0_12 = arith.constant 0 : index
      %c0_13 = arith.constant 0 : index
      %14 = vector.load %arg4[%c0_12, %c0_13] : memref<128x128xbf16, #tpu.memory_space<vmem>>, vector<128x128xbf16>
      %cst_14 = arith.constant dense<0.000000e+00> : vector<256x128xf32>
      %15 = tpu.matmul %13, %14, %cst_14 {dimension_numbers = #tpu.dot_dimension_numbers<[1], [0], [0], [1], [0, 0, 1, 1], [], []>} : vector<256x128xbf16>, vector<128x128xbf16>, vector<256x128xf32> -> vector<256x128xf32>
      %cst_15 = arith.constant 0.000000e+00 : f32
      %16 = vector.broadcast %cst_15 : f32 to vector<256x128xf32>
      %17 = arith.maximumf %15, %16 : vector<256x128xf32>
      %18 = arith.truncf %17 : vector<256x128xf32> to vector<256x128xbf16>
      %c0_16 = arith.constant 0 : index
      %c0_17 = arith.constant 0 : index
      %19 = vector.load %arg5[%c0_16, %c0_17] : memref<256x128xbf16, #tpu.memory_space<vmem>>, vector<256x128xbf16>
      tpu.vector_store %arg5[%c0_16, %c0_17], %18 {strides = array<i32>} : memref<256x128xbf16, #tpu.memory_space<vmem>>, vector<256x128xbf16>,
    } else {
    }
    return
  }
  func.func @transform_0(%arg0: i32, %arg1: i32) -> (i32, i32) {
    %c0_i32 = arith.constant 0 : i32
    return %arg0, %arg1 : i32, i32
  }
  func.func @transform_1(%arg0: i32, %arg1: i32) -> (i32, i32) {
    %c0_i32 = arith.constant 0 : i32
    %c0_i32_0 = arith.constant 0 : i32
    return %arg1, %c0_i32 : i32, i32
  }
  func.func @transform_2(%arg0: i32, %arg1: i32) -> (i32, i32) {
    %c0_i32 = arith.constant 0 : i32
    %c0_i32_0 = arith.constant 0 : i32
    %c0_i32_1 = arith.constant 0 : i32
    return %c0_i32, %c0_i32_0 : i32, i32
  }
  func.func @transform_3(%arg0: i32, %arg1: i32) -> (i32, i32) {
    %c0_i32 = arith.constant 0 : i32
    %c0_i32_0 = arith.constant 0 : i32
    return %arg0, %c0_i32 : i32, i32
  }
}

module attributes {stable_mosaic.version = 11 : i64} {
  func.func @_conv_head_kernel(%arg0: i32, %arg1: i32, %arg2: memref<256x256xbf16, #tpu.memory_space<vmem>>, %arg3: memref<256x128xbf16, #tpu.memory_space<vmem>>, %arg4: memref<128x128xbf16, #tpu.memory_space<vmem>>, %arg5: memref<128x128xbf16, #tpu.memory_space<vmem>>, %arg6: memref<1x128xf32, #tpu.memory_space<vmem>>, %arg7: memref<256x128xf32, #tpu.memory_space<vmem>>, %arg8: memref<256x128xf32, #tpu.memory_space<vmem>>) attributes {dimension_semantics = [#tpu.dimension_semantics<parallel>, #tpu.dimension_semantics<arbitrary>], iteration_bounds = array<i64: 1, 1>, scalar_prefetch = 0 : i64, scratch_operands = 1 : i64, tpu.core_type = #tpu.core_type<tc>, window_params = [{transform_indices = @transform_0, window_bounds = array<i64: 256, 256>}, {transform_indices = @transform_1, window_bounds = array<i64: 256, 128>}, {pipeline_mode = #tpu.pipeline_mode<synchronous>, transform_indices = @transform_2, window_bounds = array<i64: 128, 128>}, {pipeline_mode = #tpu.pipeline_mode<synchronous>, transform_indices = @transform_3, window_bounds = array<i64: 128, 128>}, {pipeline_mode = #tpu.pipeline_mode<synchronous>, transform_indices = @transform_4, window_bounds = array<i64: 1, 128>}, {transform_indices = @transform_5, window_bounds = array<i64: 256, 128>}]} {
    %c0_i32 = arith.constant 0 : i32
    %0 = arith.cmpi eq, %arg1, %c0_i32 : i32
    %1 = arith.extui %0 : i1 to i32
    %c0_i32_0 = arith.constant 0 : i32
    %2 = arith.cmpi ne, %1, %c0_i32_0 : i32
    scf.if %2 {
      %cst_10 = arith.constant 0.000000e+00 : f32
      %12 = vector.broadcast %cst_10 : f32 to vector<256x128xf32>
      %c0_11 = arith.constant 0 : index
      %c0_12 = arith.constant 0 : index
      %13 = vector.load %arg8[%c0_11, %c0_12] : memref<256x128xf32, #tpu.memory_space<vmem>>, vector<256x128xf32>
      tpu.vector_store %arg8[%c0_11, %c0_12], %12 {strides = array<i32>} : memref<256x128xf32, #tpu.memory_space<vmem>>, vector<256x128xf32>,
    } else {
    }
    %c0 = arith.constant 0 : index
    %c0_1 = arith.constant 0 : index
    %3 = vector.load %arg8[%c0, %c0_1] : memref<256x128xf32, #tpu.memory_space<vmem>>, vector<256x128xf32>
    %c0_2 = arith.constant 0 : index
    %c0_3 = arith.constant 0 : index
    %4 = vector.load %arg2[%c0_2, %c0_3] : memref<256x256xbf16, #tpu.memory_space<vmem>>, vector<256x256xbf16>
    %c0_4 = arith.constant 0 : index
    %c0_5 = arith.constant 0 : index
    %5 = vector.load %arg3[%c0_4, %c0_5] : memref<256x128xbf16, #tpu.memory_space<vmem>>, vector<256x128xbf16>
    %cst = arith.constant dense<0.000000e+00> : vector<256x128xf32>
    %6 = tpu.matmul %4, %5, %cst {dimension_numbers = #tpu.dot_dimension_numbers<[1], [0], [0], [1], [0, 0, 1, 1], [], []>} : vector<256x256xbf16>, vector<256x128xbf16>, vector<256x128xf32> -> vector<256x128xf32>
    %7 = arith.addf %3, %6 : vector<256x128xf32>
    %c0_6 = arith.constant 0 : index
    %c0_7 = arith.constant 0 : index
    %8 = vector.load %arg8[%c0_6, %c0_7] : memref<256x128xf32, #tpu.memory_space<vmem>>, vector<256x128xf32>
    tpu.vector_store %arg8[%c0_6, %c0_7], %7 {strides = array<i32>} : memref<256x128xf32, #tpu.memory_space<vmem>>, vector<256x128xf32>,
    %c0_i32_8 = arith.constant 0 : i32
    %9 = arith.cmpi eq, %arg1, %c0_i32_8 : i32
    %10 = arith.extui %9 : i1 to i32
    %c0_i32_9 = arith.constant 0 : i32
    %11 = arith.cmpi ne, %10, %c0_i32_9 : i32
    scf.if %11 {
      %c0_10 = arith.constant 0 : index
      %c0_11 = arith.constant 0 : index
      %12 = vector.load %arg8[%c0_10, %c0_11] : memref<256x128xf32, #tpu.memory_space<vmem>>, vector<256x128xf32>
      %13 = arith.truncf %12 : vector<256x128xf32> to vector<256x128xbf16>
      %c0_12 = arith.constant 0 : index
      %c0_13 = arith.constant 0 : index
      %14 = vector.load %arg4[%c0_12, %c0_13] : memref<128x128xbf16, #tpu.memory_space<vmem>>, vector<128x128xbf16>
      %cst_14 = arith.constant dense<0.000000e+00> : vector<256x128xf32>
      %15 = tpu.matmul %13, %14, %cst_14 {dimension_numbers = #tpu.dot_dimension_numbers<[1], [0], [0], [1], [0, 0, 1, 1], [], []>} : vector<256x128xbf16>, vector<128x128xbf16>, vector<256x128xf32> -> vector<256x128xf32>
      %cst_15 = arith.constant 0.000000e+00 : f32
      %16 = vector.broadcast %cst_15 : f32 to vector<256x128xf32>
      %17 = arith.maximumf %15, %16 : vector<256x128xf32>
      %18 = arith.truncf %17 : vector<256x128xf32> to vector<256x128xbf16>
      %c0_16 = arith.constant 0 : index
      %c0_17 = arith.constant 0 : index
      %19 = vector.load %arg5[%c0_16, %c0_17] : memref<128x128xbf16, #tpu.memory_space<vmem>>, vector<128x128xbf16>
      %cst_18 = arith.constant dense<0.000000e+00> : vector<256x128xf32>
      %20 = tpu.matmul %18, %19, %cst_18 {dimension_numbers = #tpu.dot_dimension_numbers<[1], [0], [0], [1], [0, 0, 1, 1], [], []>} : vector<256x128xbf16>, vector<128x128xbf16>, vector<256x128xf32> -> vector<256x128xf32>
      %c0_19 = arith.constant 0 : index
      %c0_20 = arith.constant 0 : index
      %21 = vector.load %arg6[%c0_19, %c0_20] : memref<1x128xf32, #tpu.memory_space<vmem>>, vector<1x128xf32>
      %22 = vector.broadcast %21 : vector<1x128xf32> to vector<256x128xf32>
      %23 = arith.addf %20, %22 : vector<256x128xf32>
      %24 = tpu.iota {dimensions = array<i32: 1>} : vector<256x128xi32>
      %c8_i32 = arith.constant 8 : i32
      %25 = vector.broadcast %c8_i32 : i32 to vector<256x128xi32>
      %26 = arith.cmpi slt, %24, %25 : vector<256x128xi32>
      %cst_21 = arith.constant -1.000000e+30 : f32
      %27 = vector.broadcast %cst_21 : f32 to vector<256x128xf32>
      %28 = arith.select %26, %23, %27 : vector<256x128xi1>, vector<256x128xf32>
      %cst_22 = arith.constant dense<0xFF800000> : vector<256xf32>
      %29 = vector.multi_reduction <maximumf>, %28, %cst_22 [1] : vector<256x128xf32> to vector<256xf32>
      %30 = vector.shape_cast %29 : vector<256xf32> to vector<256x1xf32>
      %31 = vector.broadcast %30 : vector<256x1xf32> to vector<256x128xf32>
      %32 = arith.subf %28, %31 : vector<256x128xf32>
      %33 = math.exp %32 : vector<256x128xf32>
      %cst_23 = arith.constant 0.000000e+00 : f32
      %34 = vector.broadcast %cst_23 : f32 to vector<256x128xf32>
      %35 = arith.select %26, %33, %34 : vector<256x128xi1>, vector<256x128xf32>
      %cst_24 = arith.constant dense<0.000000e+00> : vector<256xf32>
      %36 = vector.multi_reduction <add>, %35, %cst_24 [1] : vector<256x128xf32> to vector<256xf32>
      %37 = vector.shape_cast %36 : vector<256xf32> to vector<256x1xf32>
      %38 = math.log %37 : vector<256x1xf32>
      %39 = vector.broadcast %30 : vector<256x1xf32> to vector<256x128xf32>
      %40 = arith.subf %28, %39 : vector<256x128xf32>
      %41 = vector.broadcast %38 : vector<256x1xf32> to vector<256x128xf32>
      %42 = arith.subf %40, %41 : vector<256x128xf32>
      %c0_25 = arith.constant 0 : index
      %c0_26 = arith.constant 0 : index
      %43 = vector.load %arg7[%c0_25, %c0_26] : memref<256x128xf32, #tpu.memory_space<vmem>>, vector<256x128xf32>
      tpu.vector_store %arg7[%c0_25, %c0_26], %42 {strides = array<i32>} : memref<256x128xf32, #tpu.memory_space<vmem>>, vector<256x128xf32>,
    } else {
    }
    return
  }
  func.func @transform_0(%arg0: i32, %arg1: i32) -> (i32, i32) {
    %c0_i32 = arith.constant 0 : i32
    return %arg0, %arg1 : i32, i32
  }
  func.func @transform_1(%arg0: i32, %arg1: i32) -> (i32, i32) {
    %c0_i32 = arith.constant 0 : i32
    %c0_i32_0 = arith.constant 0 : i32
    return %arg1, %c0_i32 : i32, i32
  }
  func.func @transform_2(%arg0: i32, %arg1: i32) -> (i32, i32) {
    %c0_i32 = arith.constant 0 : i32
    %c0_i32_0 = arith.constant 0 : i32
    %c0_i32_1 = arith.constant 0 : i32
    return %c0_i32, %c0_i32_0 : i32, i32
  }
  func.func @transform_3(%arg0: i32, %arg1: i32) -> (i32, i32) {
    %c0_i32 = arith.constant 0 : i32
    %c0_i32_0 = arith.constant 0 : i32
    %c0_i32_1 = arith.constant 0 : i32
    return %c0_i32, %c0_i32_0 : i32, i32
  }
  func.func @transform_4(%arg0: i32, %arg1: i32) -> (i32, i32) {
    %c0_i32 = arith.constant 0 : i32
    %c0_i32_0 = arith.constant 0 : i32
    %c0_i32_1 = arith.constant 0 : i32
    return %c0_i32, %c0_i32_0 : i32, i32
  }
  func.func @transform_5(%arg0: i32, %arg1: i32) -> (i32, i32) {
    %c0_i32 = arith.constant 0 : i32
    %c0_i32_0 = arith.constant 0 : i32
    return %arg0, %c0_i32 : i32, i32
  }
}

</mosaic_0001>

<bundles_post_ra>
// kernel: gcn_forward.2
= control target key start
LH: loop header
LB: loop body
LE: loop exit
PB: predicated region body
PF: predicated region fallthrough
CT: control target
= control target key end

     0   :  { %s1823_s1 = inlined_call_operand.vmem [shape: bf16[256,128], index: 1, kind: input, shape index: {}]   ;;  %s1824_s0 = inlined_call_operand.vmem [shape: bf16[256,256], index: 0, kind: input, shape index: {}]   ;;  %s1825_s2 = inlined_call_operand.vmem [shape: bf16[128,128], index: 2, kind: input, shape index: {}]   ;;  %s1826_s3 = inlined_call_operand.vmem [shape: bf16[256,128], index: 3, kind: output, shape index: {}]  }
   0x1   :  { %v1515_v0 = vld [vmem:[%s1823_s1 + $0x78] sm:$0xff]   ;;  %v1517_v2 = vld [vmem:[%s1823_s1 + $0x70] sm:$0xff]   ;;  %v1519_v4 = vld [vmem:[%s1823_s1 + $0x68] sm:$0xff]  }
   0x2   :  { %v1516_v1 = vld [vmem:[%s1823_s1 + $0x38] sm:$0xff]   ;;  %1315 = vmatprep.subr.bf16.mxu0 %v1515_v0  ;;  %1499 = vmatprep.subr.bf16.mxu1 %v1515_v0  ;;  %v1518_v3 = vld [vmem:[%s1823_s1 + $0x30] sm:$0xff]   ;;  %v1520_v5 = vld [vmem:[%s1823_s1 + $0x28] sm:$0xff]  }
   0x3   :  { %1316 = vmatpush3.bf16.msra.mxu0 %v1516_v1  ;;  %1507 = vmatpush3.bf16.msra.mxu1 %v1516_v1  ;;  %v1521_v6 = vld [vmem:[%s1823_s1 + $0x60] sm:$0xff]   ;;  %v1523_v8 = vld [vmem:[%s1823_s1 + $0x58] sm:$0xff]   ;;  %v1525_v10 = vld [vmem:[%s1823_s1 + $0x50] sm:$0xff]  }
   0x4   :  { %1317 = vmatprep.subr.bf16.mxu0 %v1517_v2  ;;  %1500 = vmatprep.subr.bf16.mxu1 %v1517_v2  ;;  %v1522_v7 = vld [vmem:[%s1823_s1 + $0x20] sm:$0xff]   ;;  %v1524_v9 = vld [vmem:[%s1823_s1 + $0x18] sm:$0xff]   ;;  %v1526_v12 = vld [vmem:[%s1823_s1 + $0x10] sm:$0xff]  }
   0x5   :  { %v1533_v11 = vld [vmem:[%s1824_s0 + $0x4] ss:$8 sps:$4 sm:$0xff]   ;;  %v1531_v17 = vld [vmem:[%s1824_s0] ss:$8 sps:$4 sm:$0xff]   ;;  %v1534_v19 = vld [vmem:[%s1824_s0 + $0x14] ss:$8 sps:$4 sm:$0xff]  }
   0x6   :  { %435 = vmatprep.mubr.bf16.mxu0 %v1533_v11  ;;  %v1527_v13 = vld [vmem:[%s1823_s1 + $0x48] sm:$0xff]   ;;  %v1529_v15 = vld [vmem:[%s1823_s1 + $0x40] sm:$0xff]   ;;  %v1567_v21 = vld [vmem:[%s1824_s0 + $0xd4] ss:$8 sps:$4 sm:$0xff]  }
   0x7   :  { %1318 = vmatpush3.bf16.msra.mxu0 %v1518_v3  ;;  %1508 = vmatpush3.bf16.msra.mxu1 %v1518_v3  ;;  %v1528_v14 = vld [vmem:[%s1823_s1 + $0x8] sm:$0xff]   ;;  %v1530_v16 = vld [vmem:[%s1823_s1] sm:$0xff]   ;;  %v1536_v22 = vld [vmem:[%s1824_s0 + $0x10] ss:$8 sps:$4 sm:$0xff]  }
   0x8   :  { %1319 = vmatprep.subr.bf16.mxu0 %v1519_v4  ;;  %1501 = vmatprep.subr.bf16.mxu1 %v1519_v4  ;;  %v1563_v18 = vld [vmem:[%s1824_s0 + $0xc4] ss:$8 sps:$4 sm:$0xff]   ;;  %v1561_v20 = vld [vmem:[%s1824_s0 + $0xc0] ss:$8 sps:$4 sm:$0xff]   ;;  %v1569_v24 = vld [vmem:[%s1824_s0 + $0xd0] ss:$8 sps:$4 sm:$0xff]  }
   0x9   :  { %531 = vmatprep.mubr.bf16.mxu1 %v1563_v18  ;;  %v1537_v23 = vld [vmem:[%s1824_s0 + $0x24] ss:$8 sps:$4 sm:$0xff]   ;;  %v1579_v25 = vld [vmem:[%s1825_s2 + $0x38] sm:$0xff]   ;;  %v1580_v26 = vld [vmem:[%s1825_s2 + $0x30] sm:$0xff]  }
   0xa   :  { %v1573_v27 = vld [vmem:[%s1824_s0 + $0xe4] ss:$8 sps:$4 sm:$0xff]   ;;  %v1539_v29 = vld [vmem:[%s1824_s0 + $0x20] ss:$8 sps:$4 sm:$0xff]   ;;  %v1540_v31 = vld [vmem:[%s1824_s0 + $0x34] ss:$8 sps:$4 sm:$0xff]  }
   0xb   :  { %1320 = vmatpush3.bf16.msra.mxu0 %v1520_v5  ;;  %1509 = vmatpush3.bf16.msra.mxu1 %v1520_v5  ;;  %v1581_v28 = vld [vmem:[%s1825_s2 + $0x28] sm:$0xff]   ;;  %v1582_v30 = vld [vmem:[%s1825_s2 + $0x20] sm:$0xff]   ;;  %v1576_v33 = vld [vmem:[%s1824_s0 + $0xf4] ss:$8 sps:$4 sm:$0xff]  }
   0xc   :  { %1321 = vmatprep.subr.bf16.mxu0 %v1521_v6  ;;  %1502 = vmatprep.subr.bf16.mxu1 %v1521_v6  ;;  %v1575_v32 = vld [vmem:[%s1824_s0 + $0xe0] ss:$8 sps:$4 sm:$0xff]   ;;  %v1542_v34 = vld [vmem:[%s1824_s0 + $0x30] ss:$8 sps:$4 sm:$0xff]   ;;  %v1543_v35 = vld [vmem:[%s1824_s0 + $0x44] ss:$8 sps:$4 sm:$0xff]  }
   0xd   :  { %v1578_v36 = vld [vmem:[%s1824_s0 + $0xf0] ss:$8 sps:$4 sm:$0xff]   ;;  %v1545_v37 = vld [vmem:[%s1824_s0 + $0x40] ss:$8 sps:$4 sm:$0xff]   ;;  %v1546_v38 = vld [vmem:[%s1824_s0 + $0x54] ss:$8 sps:$4 sm:$0xff]  }
   0xe   :  { %v1548_v39 = vld [vmem:[%s1824_s0 + $0x50] ss:$8 sps:$4 sm:$0xff]   ;;  %v1549_v40 = vld [vmem:[%s1824_s0 + $0x64] ss:$8 sps:$4 sm:$0xff]   ;;  %v1551_v41 = vld [vmem:[%s1824_s0 + $0x60] ss:$8 sps:$4 sm:$0xff]  }
   0xf   :  { %1322 = vmatpush3.bf16.msra.mxu0 %v1522_v7  ;;  %1510 = vmatpush3.bf16.msra.mxu1 %v1522_v7  ;;  %v1552_v42 = vld [vmem:[%s1824_s0 + $0x74] ss:$8 sps:$4 sm:$0xff]   ;;  %v1554_v43 = vld [vmem:[%s1824_s0 + $0x70] ss:$8 sps:$4 sm:$0xff]   ;;  %v1555_v44 = vld [vmem:[%s1824_s0 + $0x84] ss:$8 sps:$4 sm:$0xff]  }
  0x10   :  { %1323 = vmatprep.subr.bf16.mxu0 %v1523_v8  ;;  %1503 = vmatprep.subr.bf16.mxu1 %v1523_v8  ;;  %v1557_v45 = vld [vmem:[%s1824_s0 + $0x80] ss:$8 sps:$4 sm:$0xff]   ;;  %v1558_v46 = vld [vmem:[%s1824_s0 + $0x94] ss:$8 sps:$4 sm:$0xff]   ;;  %v1560_v48 = vld [vmem:[%s1824_s0 + $0x90] ss:$8 sps:$4 sm:$0xff]  }
  0x11   :  { %v1583_v47 = vld [vmem:[%s1825_s2 + $0x18] sm:$0xff]   ;;  %v1564_v49 = vld [vmem:[%s1824_s0 + $0xa4] ss:$8 sps:$4 sm:$0xff]   ;;  %v1584_v50 = vld [vmem:[%s1825_s2 + $0x10] sm:$0xff]  }
  0x12   :  { %v1585_v51 = vld [vmem:[%s1825_s2 + $0x8] sm:$0xff]   ;;  %v1570_v53 = vld [vmem:[%s1824_s0 + $0xb4] ss:$8 sps:$4 sm:$0xff]   ;;  %v1586_v54 = vld [vmem:[%s1825_s2] sm:$0xff]  }
  0x13   :  { %1324 = vmatpush3.bf16.msra.mxu0 %v1524_v9  ;;  %1511 = vmatpush3.bf16.msra.mxu1 %v1524_v9  ;;  %v1566_v52 = vld [vmem:[%s1824_s0 + $0xa0] ss:$8 sps:$4 sm:$0xff]   ;;  %v1572_v55 = vld [vmem:[%s1824_s0 + $0xb0] ss:$8 sps:$4 sm:$0xff]  }
  0x14   :  { %1325 = vmatprep.subr.bf16.mxu0 %v1525_v10  ;;  %1504 = vmatprep.subr.bf16.mxu1 %v1525_v10 }
  0x17   :  { %1326 = vmatpush3.bf16.msra.mxu0 %v1526_v12  ;;  %1512 = vmatpush3.bf16.msra.mxu1 %v1526_v12 }
  0x18   :  { %1327 = vmatprep.subr.bf16.mxu0 %v1527_v13  ;;  %1505 = vmatprep.subr.bf16.mxu1 %v1527_v13 }
  0x1b   :  { %1328 = vmatpush3.bf16.msra.mxu0 %v1528_v14  ;;  %1513 = vmatpush3.bf16.msra.mxu1 %v1528_v14 }
  0x1c   :  { %1329 = vmatprep.subr.bf16.mxu0 %v1529_v15  ;;  %1506 = vmatprep.subr.bf16.mxu1 %v1529_v15 }
  0x1f   :  { %1330 = vmatpush3.bf16.msra.mxu0 %v1530_v16  ;;  %1514 = vmatpush3.bf16.msra.mxu1 %v1530_v16 }
  0x20   :  { %1451 = vmatprep.subr.bf16.mxu1 %v1579_v25 }
  0x22   :  { %436 = vmatmul.mubr.bf16.vlgmr.msra.gmra.mxu0 %v1531_v17  ;;  %532 = vmatmul.mubr.bf16.vlgmr.msra.gmra.mxu1 %v1561_v20 }
  0x23   :  { %443 = vmatprep.mubr.bf16.mxu0 %v1534_v19  ;;  %539 = vmatprep.mubr.bf16.mxu1 %v1567_v21 }
  0x24   :  { %1452 = vmatpush3.bf16.msra.mxu1 %v1579_v25 }
  0x25   :  { %1453 = vmatprep.subr.bf16.mxu1 %v1580_v26 }
  0x28   :  { %1454 = vmatpush3.bf16.msra.mxu1 %v1580_v26 }
  0x29   :  { %1455 = vmatprep.subr.bf16.mxu1 %v1581_v28 }
  0x2a   :  { %444 = vmatmul.mubr.bf16.gmra.mxu0 %v1536_v22  ;;  %540 = vmatmul.mubr.bf16.gmra.mxu1 %v1569_v24 }
  0x2b   :  { %451 = vmatprep.mubr.bf16.mxu0 %v1537_v23  ;;  %547 = vmatprep.mubr.bf16.mxu1 %v1573_v27 }
  0x2c   :  { %1456 = vmatpush3.bf16.msra.mxu1 %v1581_v28 }
  0x2d   :  { %1457 = vmatprep.subr.bf16.mxu1 %v1582_v30 }
  0x30   :  { %1458 = vmatpush3.bf16.msra.mxu1 %v1582_v30 }
  0x31   :  { %1459 = vmatprep.subr.bf16.mxu1 %v1583_v47 }
  0x32   :  { %452 = vmatmul.mubr.bf16.gmra.mxu0 %v1539_v29  ;;  %548 = vmatmul.mubr.bf16.gmra.mxu1 %v1575_v32 }
  0x33   :  { %459 = vmatprep.mubr.bf16.mxu0 %v1540_v31  ;;  %555 = vmatprep.mubr.bf16.mxu1 %v1576_v33 }
  0x34   :  { %1460 = vmatpush3.bf16.msra.mxu1 %v1583_v47 }
  0x35   :  { %1461 = vmatprep.subr.bf16.mxu1 %v1584_v50 }
  0x38   :  { %1462 = vmatpush3.bf16.msra.mxu1 %v1584_v50 }
  0x39   :  { %1463 = vmatprep.subr.bf16.mxu1 %v1585_v51 }
  0x3a   :  { %460 = vmatmul.mubr.bf16.gmra.mxu0 %v1542_v34  ;;  %556 = vmatmul.mubr.bf16.gmra.mxu1 %v1578_v36 }
  0x3b   :  { %467 = vmatprep.mubr.bf16.mxu0 %v1543_v35 }
  0x3c   :  { %1464 = vmatpush3.bf16.msra.mxu1 %v1585_v51 }
  0x3d   :  { %1465 = vmatprep.subr.bf16.mxu1 %v1586_v54 }
  0x40   :  { %1466 = vmatpush3.bf16.msra.mxu1 %v1586_v54 }
  0x42   :  { %468 = vmatmul.mubr.bf16.gmra.mxu0 %v1545_v37 }
  0x43   :  { %475 = vmatprep.mubr.bf16.mxu0 %v1546_v38 }
  0x4a   :  { %476 = vmatmul.mubr.bf16.gmra.mxu0 %v1548_v39 }
  0x4b   :  { %483 = vmatprep.mubr.bf16.mxu0 %v1549_v40 }
  0x52   :  { %484 = vmatmul.mubr.bf16.gmra.mxu0 %v1551_v41 }
  0x53   :  { %491 = vmatprep.mubr.bf16.mxu0 %v1552_v42 }
  0x5a   :  { %492 = vmatmul.mubr.bf16.gmra.mxu0 %v1554_v43 }
  0x5b   :  { %499 = vmatprep.mubr.bf16.mxu0 %v1555_v44 }
  0x62   :  { %500 = vmatmul.mubr.bf16.gmra.mxu0 %v1557_v45 }
  0x63   :  { %507 = vmatprep.mubr.bf16.mxu0 %v1558_v46 }
  0x6a   :  { %508 = vmatmul.mubr.bf16.gmra.mxu0 %v1560_v48 }
  0x6b   :  { %515 = vmatprep.mubr.bf16.mxu0 %v1564_v49 }
  0x72   :  { %516 = vmatmul.mubr.bf16.gmra.mxu0 %v1566_v52 }
  0x73   :  { %523 = vmatprep.mubr.bf16.mxu0 %v1570_v53 }
  0x7a   :  { %524 = vmatmul.mubr.bf16.gmra.mxu0 %v1572_v55 }
  0xe2   :  { %v1331_v56 = vpop.f32.mrf.mxu0  ;;  %v1403_v31 = vpop.f32.mrf.mxu1 }
  0xe4   :  { %v1332_v57 = vpop.f32.mrf.mxu0  ;;  %v1404_v37 = vpop.f32.mrf.mxu1 }
  0xe5   :  { %v1333_v60 = vadd.f32 %v1332_v57, %v1331_v56 }
  0xe6   :  { %v1334_v58 = vpop.f32.mrf.mxu0  ;;  %v1406_v40 = vpop.f32.mrf.mxu1 }
  0xe8   :  { %v1335_v59 = vpop.f32.mrf.mxu0  ;;  %v1407_v46 = vpop.f32.mrf.mxu1 }
  0xe9   :  { %v1336_v61 = vadd.f32 %v1335_v59, %v1334_v58 }
  0xea   :  { %v1337_v62 = vpop.f32.mrf.mxu0  ;;  %v1409_v49 = vpop.f32.mrf.mxu1 }
  0xeb   :  { %v663_v63 = vpack.c.bf16 %v1336_v61, %v1333_v60 }
  0xec   :  { %v1338_v0 = vpop.f32.mrf.mxu0  ;;  %v1410_v55 = vpop.f32.mrf.mxu1 }
  0xed   :  { %1467 = vmatprep.mubr.bf16.mxu1 %v663_v63  ;;  %v1339_v3 = vadd.f32 %v1338_v0, %v1337_v62 }
  0xee   :  { %v1340_v1 = vpop.f32.mrf.mxu0  ;;  %v1412_v58 = vpop.f32.mrf.mxu1 }
  0xf0   :  { %v1341_v2 = vpop.f32.mrf.mxu0  ;;  %v1413_v0 = vpop.f32.mrf.mxu1 }
  0xf1   :  { %v1342_v4 = vadd.f32 %v1341_v2, %v1340_v1 }
  0xf2   :  { %v1343_v5 = vpop.f32.mrf.mxu0 }
  0xf3   :  { %v664_v6 = vpack.c.bf16 %v1342_v4, %v1339_v3  ;;  %v1415_v3 = vpop.f32.mrf.mxu1 }
  0xf4   :  { %v1344_v7 = vpop.f32.mrf.mxu0 }
  0xf5   :  { %1468 = vmatmul.mubr.bf16.vlgmr.msra.gmra.mxu1 %v664_v6  ;;  %v1345_v10 = vadd.f32 %v1344_v7, %v1343_v5 }
  0xf6   :  { %v1346_v8 = vpop.f32.mrf.mxu0 }
  0xf8   :  { %v1347_v9 = vpop.f32.mrf.mxu0 }
  0xf9   :  { %v1348_v11 = vadd.f32 %v1347_v9, %v1346_v8  ;;  %v1416_v9 = vpop.f32.mrf.mxu1 }
  0xfa   :  { %v1349_v12 = vpop.f32.mrf.mxu0 }
  0xfb   :  { %v665_v13 = vpack.c.bf16 %v1348_v11, %v1345_v10 }
  0xfc   :  { %v1350_v14 = vpop.f32.mrf.mxu0 }
  0xfd   :  { %1471 = vmatprep.mubr.bf16.mxu1 %v665_v13  ;;  %v1351_v17 = vadd.f32 %v1350_v14, %v1349_v12  ;;  %v1418_v12 = vpop.f32.mrf.mxu1 }
  0xfe   :  { %v1352_v15 = vpop.f32.mrf.mxu0 }
 0x100   :  { %v1353_v16 = vpop.f32.mrf.mxu0 }
 0x101   :  { %v1354_v18 = vadd.f32 %v1353_v16, %v1352_v15 }
 0x102   :  { %v1355_v19 = vpop.f32.mrf.mxu0 }
 0x103   :  { %v666_v20 = vpack.c.bf16 %v1354_v18, %v1351_v17  ;;  %v1419_v18 = vpop.f32.mrf.mxu1 }
 0x104   :  { %v1356_v21 = vpop.f32.mrf.mxu0 }
 0x105   :  { %1472 = vmatmul.mubr.bf16.gmra.mxu1 %v666_v20  ;;  %v1357_v24 = vadd.f32 %v1356_v21, %v1355_v19  ;;  %v1405_v20 = vadd.f32 %v1404_v37, %v1403_v31  ;;  %v1408_v21 = vadd.f32 %v1407_v46, %v1406_v40 }
 0x106   :  { %v1358_v22 = vpop.f32.mrf.mxu0 }
 0x108   :  { %v1359_v23 = vpop.f32.mrf.mxu0 }
 0x109   :  { %v1360_v25 = vadd.f32 %v1359_v23, %v1358_v22  ;;  %v1421_v23 = vpop.f32.mrf.mxu1 }
 0x10a   :  { %v1361_v26 = vpop.f32.mrf.mxu0 }
 0x10b   :  { %v667_v27 = vpack.c.bf16 %v1360_v25, %v1357_v24 }
 0x10c   :  { %v1362_v28 = vpop.f32.mrf.mxu0 }
 0x10d   :  { %1475 = vmatprep.mubr.bf16.mxu1 %v667_v27  ;;  %v1363_v32 = vadd.f32 %v1362_v28, %v1361_v26  ;;  %v675_v27 = vpack.c.bf16 %v1408_v21, %v1405_v20  ;;  %v1422_v28 = vpop.f32.mrf.mxu1 }
 0x10e   :  { %v1364_v29 = vpop.f32.mrf.mxu0  ;;  %v1423_v31 = vadd.f32 %v1422_v28, %v1421_v23 }
 0x110   :  { %v1365_v30 = vpop.f32.mrf.mxu0 }
 0x111   :  { %v1366_v33 = vadd.f32 %v1365_v30, %v1364_v29  ;;  %v1411_v29 = vadd.f32 %v1410_v55, %v1409_v49  ;;  %v1414_v30 = vadd.f32 %v1413_v0, %v1412_v58 }
 0x112   :  { %v1367_v34 = vpop.f32.mrf.mxu0 }
 0x113   :  { %v668_v35 = vpack.c.bf16 %v1366_v33, %v1363_v32  ;;  %v1417_v32 = vadd.f32 %v1416_v9, %v1415_v3  ;;  %v1420_v33 = vadd.f32 %v1419_v18, %v1418_v12 }
 0x114   :  { %v1368_v36 = vpop.f32.mrf.mxu0 }
 0x115   :  { %1476 = vmatmul.mubr.bf16.gmra.mxu1 %v668_v35  ;;  %v1369_v41 = vadd.f32 %v1368_v36, %v1367_v34  ;;  %v1424_v34 = vpop.f32.mrf.mxu1  ;;  %v676_v35 = vpack.c.bf16 %v1414_v30, %v1411_v29  ;;  %v677_v36 = vpack.c.bf16 %v1420_v33, %v1417_v32 }
 0x116   :  { %v1370_v38 = vpop.f32.mrf.mxu0 }
 0x118   :  { %v1371_v39 = vpop.f32.mrf.mxu0 }
 0x119   :  { %v1372_v42 = vadd.f32 %v1371_v39, %v1370_v38  ;;  %v1425_v38 = vpop.f32.mrf.mxu1 }
 0x11a   :  { %v1373_v43 = vpop.f32.mrf.mxu0  ;;  %v1426_v37 = vadd.f32 %v1425_v38, %v1424_v34 }
 0x11b   :  { %v669_v44 = vpack.c.bf16 %v1372_v42, %v1369_v41 }
 0x11c   :  { %v1374_v45 = vpop.f32.mrf.mxu0  ;;  %v678_v39 = vpack.c.bf16 %v1426_v37, %v1423_v31 }
 0x11d   :  { %1479 = vmatprep.mubr.bf16.mxu1 %v669_v44  ;;  %v1375_v50 = vadd.f32 %v1374_v45, %v1373_v43 }
 0x11e   :  { %v1376_v47 = vpop.f32.mrf.mxu0 }
 0x120   :  { %v1377_v48 = vpop.f32.mrf.mxu0 }
 0x121   :  { %v1378_v51 = vadd.f32 %v1377_v48, %v1376_v47 }
 0x122   :  { %v1379_v52 = vpop.f32.mrf.mxu0 }
 0x123   :  { %v670_v53 = vpack.c.bf16 %v1378_v51, %v1375_v50 }
 0x124   :  { %v1380_v54 = vpop.f32.mrf.mxu0 }
 0x125   :  { %1480 = vmatmul.mubr.bf16.gmra.mxu1 %v670_v53  ;;  %v1381_v59 = vadd.f32 %v1380_v54, %v1379_v52 }
 0x126   :  { %v1382_v56 = vpop.f32.mrf.mxu0 }
 0x128   :  { %v1383_v57 = vpop.f32.mrf.mxu0 }
 0x129   :  { %v1384_v60 = vadd.f32 %v1383_v57, %v1382_v56 }
 0x12a   :  { %v1385_v61 = vpop.f32.mrf.mxu0 }
 0x12b   :  { %v671_v62 = vpack.c.bf16 %v1384_v60, %v1381_v59 }
 0x12c   :  { %v1386_v63 = vpop.f32.mrf.mxu0 }
 0x12d   :  { %1483 = vmatprep.mubr.bf16.mxu1 %v671_v62  ;;  %v1387_v4 = vadd.f32 %v1386_v63, %v1385_v61 }
 0x12e   :  { %v1388_v1 = vpop.f32.mrf.mxu0 }
 0x130   :  { %v1389_v2 = vpop.f32.mrf.mxu0 }
 0x131   :  { %v1390_v5 = vadd.f32 %v1389_v2, %v1388_v1 }
 0x132   :  { %v1391_v6 = vpop.f32.mrf.mxu0 }
 0x133   :  { %v672_v7 = vpack.c.bf16 %v1390_v5, %v1387_v4 }
 0x134   :  { %v1392_v8 = vpop.f32.mrf.mxu0 }
 0x135   :  { %1484 = vmatmul.mubr.bf16.gmra.mxu1 %v672_v7  ;;  %v1393_v13 = vadd.f32 %v1392_v8, %v1391_v6 }
 0x136   :  { %v1394_v10 = vpop.f32.mrf.mxu0 }
 0x138   :  { %v1395_v11 = vpop.f32.mrf.mxu0 }
 0x139   :  { %v1396_v14 = vadd.f32 %v1395_v11, %v1394_v10 }
 0x13a   :  { %v1397_v15 = vpop.f32.mrf.mxu0 }
 0x13b   :  { %v673_v16 = vpack.c.bf16 %v1396_v14, %v1393_v13 }
 0x13c   :  { %v1398_v17 = vpop.f32.mrf.mxu0 }
 0x13d   :  { %1487 = vmatprep.mubr.bf16.mxu1 %v673_v16  ;;  %v1399_v24 = vadd.f32 %v1398_v17, %v1397_v15 }
 0x13e   :  { %v1400_v19 = vpop.f32.mrf.mxu0 }
 0x140   :  { %v1401_v22 = vpop.f32.mrf.mxu0 }
 0x141   :  { %v1402_v25 = vadd.f32 %v1401_v22, %v1400_v19 }
 0x143   :  { %v674_v26 = vpack.c.bf16 %v1402_v25, %v1399_v24 }
 0x145   :  { %1488 = vmatmul.mubr.bf16.gmra.mxu1 %v674_v26 }
 0x146   :  { %1491 = vmatprep.mubr.bf16.mxu1 %v675_v27 }
 0x14d   :  { %1492 = vmatmul.mubr.bf16.gmra.mxu1 %v676_v35 }
 0x14e   :  { %1495 = vmatprep.mubr.bf16.mxu1 %v677_v36 }
 0x155   :  { %1496 = vmatmul.mubr.bf16.gmra.mxu1 %v678_v39 }
 0x1b5   :  { %v1469_v40 = vpop.f32.mrf.mxu1 }
 0x1b6   :  { %v906_v43 = vmax.f32 %v1469_v40, 0.0 }
 0x1b7   :  { %v777_v41 = vpop.f32.mrf.mxu1 }
 0x1b8   :  { %v904_v46 = vmax.f32 %v777_v41, 0.0 }
 0x1b9   :  { %v1470_v42 = vpop.f32.mrf.mxu1 }
 0x1ba   :  { %v907_v44 = vmax.f32 %v1470_v42, 0.0 }
 0x1bb   :  { %v780_v45 = vpop.f32.mrf.mxu1 }
 0x1bc   :  { %v1228_v47 = vpack.c.bf16 %v907_v44, %v906_v43  ;;  %v905_v48 = vmax.f32 %v780_v45, 0.0 }
 0x1be   :  { %1300 = vst [vmem:[%s1826_s3 + $0x8] sm:$0xff] %v1228_v47   ;;  %v1223_v49 = vpack.c.bf16 %v905_v48, %v904_v46 }
 0x1c0   :  { %1224 = vst [vmem:[%s1826_s3] sm:$0xff] %v1223_v49  }
 0x1c5   :  { %v1473_v50 = vpop.f32.mrf.mxu1 }
 0x1c6   :  { %v910_v53 = vmax.f32 %v1473_v50, 0.0 }
 0x1c7   :  { %v793_v51 = vpop.f32.mrf.mxu1 }
 0x1c8   :  { %v908_v56 = vmax.f32 %v793_v51, 0.0 }
 0x1c9   :  { %v1474_v52 = vpop.f32.mrf.mxu1 }
 0x1ca   :  { %v911_v54 = vmax.f32 %v1474_v52, 0.0 }
 0x1cb   :  { %v796_v55 = vpop.f32.mrf.mxu1 }
 0x1cc   :  { %v1238_v57 = vpack.c.bf16 %v911_v54, %v910_v53  ;;  %v909_v58 = vmax.f32 %v796_v55, 0.0 }
 0x1ce   :  { %1302 = vst [vmem:[%s1826_s3 + $0x18] sm:$0xff] %v1238_v57   ;;  %v1233_v59 = vpack.c.bf16 %v909_v58, %v908_v56 }
 0x1d0   :  { %1301 = vst [vmem:[%s1826_s3 + $0x10] sm:$0xff] %v1233_v59  }
 0x1d5   :  { %v1477_v60 = vpop.f32.mrf.mxu1 }
 0x1d6   :  { %v914_v63 = vmax.f32 %v1477_v60, 0.0 }
 0x1d7   :  { %v809_v61 = vpop.f32.mrf.mxu1 }
 0x1d8   :  { %v912_v2 = vmax.f32 %v809_v61, 0.0 }
 0x1d9   :  { %v1478_v62 = vpop.f32.mrf.mxu1 }
 0x1da   :  { %v915_v0 = vmax.f32 %v1478_v62, 0.0 }
 0x1db   :  { %v812_v1 = vpop.f32.mrf.mxu1 }
 0x1dc   :  { %v1248_v3 = vpack.c.bf16 %v915_v0, %v914_v63  ;;  %v913_v4 = vmax.f32 %v812_v1, 0.0 }
 0x1de   :  { %1304 = vst [vmem:[%s1826_s3 + $0x28] sm:$0xff] %v1248_v3   ;;  %v1243_v5 = vpack.c.bf16 %v913_v4, %v912_v2 }
 0x1e0   :  { %1303 = vst [vmem:[%s1826_s3 + $0x20] sm:$0xff] %v1243_v5  }
 0x1e5   :  { %v1481_v6 = vpop.f32.mrf.mxu1 }
 0x1e6   :  { %v918_v9 = vmax.f32 %v1481_v6, 0.0 }
 0x1e7   :  { %v825_v7 = vpop.f32.mrf.mxu1 }
 0x1e8   :  { %v916_v12 = vmax.f32 %v825_v7, 0.0 }
 0x1e9   :  { %v1482_v8 = vpop.f32.mrf.mxu1 }
 0x1ea   :  { %v919_v10 = vmax.f32 %v1482_v8, 0.0 }
 0x1eb   :  { %v828_v11 = vpop.f32.mrf.mxu1 }
 0x1ec   :  { %v1258_v13 = vpack.c.bf16 %v919_v10, %v918_v9  ;;  %v917_v14 = vmax.f32 %v828_v11, 0.0 }
 0x1ee   :  { %1306 = vst [vmem:[%s1826_s3 + $0x38] sm:$0xff] %v1258_v13   ;;  %v1253_v15 = vpack.c.bf16 %v917_v14, %v916_v12 }
 0x1f0   :  { %1305 = vst [vmem:[%s1826_s3 + $0x30] sm:$0xff] %v1253_v15  }
 0x1f5   :  { %v1485_v16 = vpop.f32.mrf.mxu1 }
 0x1f6   :  { %v922_v19 = vmax.f32 %v1485_v16, 0.0 }
 0x1f7   :  { %v841_v17 = vpop.f32.mrf.mxu1 }
 0x1f8   :  { %v920_v22 = vmax.f32 %v841_v17, 0.0 }
 0x1f9   :  { %v1486_v18 = vpop.f32.mrf.mxu1 }
 0x1fa   :  { %v923_v20 = vmax.f32 %v1486_v18, 0.0 }
 0x1fb   :  { %v844_v21 = vpop.f32.mrf.mxu1 }
 0x1fc   :  { %v1268_v23 = vpack.c.bf16 %v923_v20, %v922_v19  ;;  %v921_v24 = vmax.f32 %v844_v21, 0.0 }
 0x1fe   :  { %1308 = vst [vmem:[%s1826_s3 + $0x48] sm:$0xff] %v1268_v23   ;;  %v1263_v25 = vpack.c.bf16 %v921_v24, %v920_v22 }
 0x200   :  { %1307 = vst [vmem:[%s1826_s3 + $0x40] sm:$0xff] %v1263_v25  }
 0x205   :  { %v1489_v26 = vpop.f32.mrf.mxu1 }
 0x206   :  { %v926_v29 = vmax.f32 %v1489_v26, 0.0 }
 0x207   :  { %v857_v27 = vpop.f32.mrf.mxu1 }
 0x208   :  { %v924_v33 = vmax.f32 %v857_v27, 0.0 }
 0x209   :  { %v1490_v28 = vpop.f32.mrf.mxu1 }
 0x20a   :  { %v927_v30 = vmax.f32 %v1490_v28, 0.0 }
 0x20b   :  { %v860_v32 = vpop.f32.mrf.mxu1 }
 0x20c   :  { %v1278_v34 = vpack.c.bf16 %v927_v30, %v926_v29  ;;  %v925_v35 = vmax.f32 %v860_v32, 0.0 }
 0x20d   :  { %v1493_v36 = vpop.f32.mrf.mxu1 }
 0x20e   :  { %1310 = vst [vmem:[%s1826_s3 + $0x58] sm:$0xff] %v1278_v34   ;;  %v1273_v38 = vpack.c.bf16 %v925_v35, %v924_v33  ;;  %v930_v39 = vmax.f32 %v1493_v36, 0.0 }
 0x20f   :  { %v873_v31 = vpop.f32.mrf.mxu1 }
 0x210   :  { %1309 = vst [vmem:[%s1826_s3 + $0x50] sm:$0xff] %v1273_v38   ;;  %v928_v42 = vmax.f32 %v873_v31, 0.0 }
 0x211   :  { %v1494_v37 = vpop.f32.mrf.mxu1 }
 0x212   :  { %v931_v40 = vmax.f32 %v1494_v37, 0.0 }
 0x213   :  { %v876_v41 = vpop.f32.mrf.mxu1 }
 0x214   :  { %v1288_v43 = vpack.c.bf16 %v931_v40, %v930_v39  ;;  %v929_v44 = vmax.f32 %v876_v41, 0.0 }
 0x215   :  { %v1497_v45 = vpop.f32.mrf.mxu1 }
 0x216   :  { %1312 = vst [vmem:[%s1826_s3 + $0x68] sm:$0xff] %v1288_v43   ;;  %v1283_v46 = vpack.c.bf16 %v929_v44, %v928_v42  ;;  %v934_v49 = vmax.f32 %v1497_v45, 0.0 }
 0x217   :  { %v889_v47 = vpop.f32.mrf.mxu1 }
 0x218   :  { %1311 = vst [vmem:[%s1826_s3 + $0x60] sm:$0xff] %v1283_v46   ;;  %v932_v52 = vmax.f32 %v889_v47, 0.0 }
 0x219   :  { %v1498_v48 = vpop.f32.mrf.mxu1 }
 0x21a   :  { %v935_v50 = vmax.f32 %v1498_v48, 0.0 }
 0x21b   :  { %v892_v51 = vpop.f32.mrf.mxu1 }
 0x21c   :  { %v1298_v53 = vpack.c.bf16 %v935_v50, %v934_v49  ;;  %v933_v54 = vmax.f32 %v892_v51, 0.0 }
 0x21e   :  { %1314 = vst [vmem:[%s1826_s3 + $0x78] sm:$0xff] %v1298_v53   ;;  %v1293_v55 = vpack.c.bf16 %v933_v54, %v932_v52 }
 0x220   :  { %1313 = vst [vmem:[%s1826_s3 + $0x70] sm:$0xff] %v1293_v55  }

// kernel: gcn_forward.3
= control target key start
LH: loop header
LB: loop body
LE: loop exit
PB: predicated region body
PF: predicated region fallthrough
CT: control target
= control target key end

     0   :  { %s2884_s1 = inlined_call_operand.vmem [shape: bf16[256,128], index: 1, kind: input, shape index: {}]   ;;  %s2885_s0 = inlined_call_operand.vmem [shape: bf16[256,256], index: 0, kind: input, shape index: {}]   ;;  %s2886_s2 = inlined_call_operand.vmem [shape: bf16[128,128], index: 2, kind: input, shape index: {}]   ;;  %s2887_s3 = inlined_call_operand.vmem [shape: bf16[128,128], index: 3, kind: input, shape index: {}]   ;;  %s2888_s4 = inlined_call_operand.vmem [shape: f32[1,128], index: 4, kind: input, shape index: {}]   ;;  %s2889_s5 = inlined_call_operand.vmem [shape: f32[256,128], index: 5, kind: output, shape index: {}]  }
   0x1   :  { %v1934_v0 = vld [vmem:[%s2884_s1 + $0x78] sm:$0xff]   ;;  %v1936_v2 = vld [vmem:[%s2884_s1 + $0x70] sm:$0xff]   ;;  %v1938_v4 = vld [vmem:[%s2884_s1 + $0x68] sm:$0xff]  }
   0x2   :  { %v1935_v1 = vld [vmem:[%s2884_s1 + $0x38] sm:$0xff]   ;;  %1678 = vmatprep.subr.bf16.mxu0 %v1934_v0  ;;  %v1937_v3 = vld [vmem:[%s2884_s1 + $0x30] sm:$0xff]   ;;  %v1939_v5 = vld [vmem:[%s2884_s1 + $0x28] sm:$0xff]  }
   0x3   :  { %1679 = vmatpush3.bf16.msra.mxu0 %v1935_v1  ;;  %v1940_v6 = vld [vmem:[%s2884_s1 + $0x60] sm:$0xff]   ;;  %v1942_v8 = vld [vmem:[%s2884_s1 + $0x58] sm:$0xff]   ;;  %v1944_v10 = vld [vmem:[%s2884_s1 + $0x50] sm:$0xff]  }
   0x4   :  { %1680 = vmatprep.subr.bf16.mxu0 %v1936_v2  ;;  %v1941_v7 = vld [vmem:[%s2884_s1 + $0x20] sm:$0xff]   ;;  %v1943_v9 = vld [vmem:[%s2884_s1 + $0x18] sm:$0xff]   ;;  %v1945_v12 = vld [vmem:[%s2884_s1 + $0x10] sm:$0xff]  }
   0x5   :  { %v1952_v11 = vld [vmem:[%s2885_s0 + $0x4] ss:$8 sps:$4 sm:$0xff]   ;;  %v1950_v17 = vld [vmem:[%s2885_s0] ss:$8 sps:$4 sm:$0xff]   ;;  %v1953_v18 = vld [vmem:[%s2885_s0 + $0x14] ss:$8 sps:$4 sm:$0xff]  }
   0x6   :  { %441 = vmatprep.mubr.bf16.mxu0 %v1952_v11  ;;  %v1946_v13 = vld [vmem:[%s2884_s1 + $0x48] sm:$0xff]   ;;  %v1948_v15 = vld [vmem:[%s2884_s1 + $0x40] sm:$0xff]   ;;  %v1955_v19 = vld [vmem:[%s2885_s0 + $0x10] ss:$8 sps:$4 sm:$0xff]  }
   0x7   :  { %1681 = vmatpush3.bf16.msra.mxu0 %v1937_v3  ;;  %v1947_v14 = vld [vmem:[%s2884_s1 + $0x8] sm:$0xff]   ;;  %v1949_v16 = vld [vmem:[%s2884_s1] sm:$0xff]   ;;  %v1998_v21 = vld [vmem:[%s2886_s2 + $0x38] sm:$0xff]  }
   0x8   :  { %1682 = vmatprep.subr.bf16.mxu0 %v1938_v4  ;;  %v1956_v20 = vld [vmem:[%s2885_s0 + $0x24] ss:$8 sps:$4 sm:$0xff]   ;;  %v1999_v22 = vld [vmem:[%s2886_s2 + $0x30] sm:$0xff]   ;;  %1838 = vmatprep.subr.bf16.mxu1 %v1998_v21  ;;  %v1958_v24 = vld [vmem:[%s2885_s0 + $0x20] ss:$8 sps:$4 sm:$0xff]  }
   0x9   :  { %1839 = vmatpush3.bf16.msra.mxu1 %v1998_v21  ;;  %v2000_v23 = vld [vmem:[%s2886_s2 + $0x28] sm:$0xff]   ;;  %v2001_v25 = vld [vmem:[%s2886_s2 + $0x20] sm:$0xff]   ;;  %v1959_v26 = vld [vmem:[%s2885_s0 + $0x34] ss:$8 sps:$4 sm:$0xff]  }
   0xa   :  { %1840 = vmatprep.subr.bf16.mxu1 %v1999_v22  ;;  %v1961_v27 = vld [vmem:[%s2885_s0 + $0x30] ss:$8 sps:$4 sm:$0xff]   ;;  %v1962_v28 = vld [vmem:[%s2885_s0 + $0x44] ss:$8 sps:$4 sm:$0xff]   ;;  %v1964_v29 = vld [vmem:[%s2885_s0 + $0x40] ss:$8 sps:$4 sm:$0xff]  }
   0xb   :  { %1683 = vmatpush3.bf16.msra.mxu0 %v1939_v5  ;;  %v1965_v30 = vld [vmem:[%s2885_s0 + $0x54] ss:$8 sps:$4 sm:$0xff]   ;;  %v1967_v31 = vld [vmem:[%s2885_s0 + $0x50] ss:$8 sps:$4 sm:$0xff]   ;;  %v1968_v32 = vld [vmem:[%s2885_s0 + $0x64] ss:$8 sps:$4 sm:$0xff]  }
   0xc   :  { %1684 = vmatprep.subr.bf16.mxu0 %v1940_v6  ;;  %v1970_v33 = vld [vmem:[%s2885_s0 + $0x60] ss:$8 sps:$4 sm:$0xff]   ;;  %v1971_v34 = vld [vmem:[%s2885_s0 + $0x74] ss:$8 sps:$4 sm:$0xff]   ;;  %v1973_v35 = vld [vmem:[%s2885_s0 + $0x70] ss:$8 sps:$4 sm:$0xff]  }
   0xd   :  { %1841 = vmatpush3.bf16.msra.mxu1 %v1999_v22  ;;  %v1974_v36 = vld [vmem:[%s2885_s0 + $0x84] ss:$8 sps:$4 sm:$0xff]   ;;  %v1976_v37 = vld [vmem:[%s2885_s0 + $0x80] ss:$8 sps:$4 sm:$0xff]   ;;  %v1977_v38 = vld [vmem:[%s2885_s0 + $0x94] ss:$8 sps:$4 sm:$0xff]  }
   0xe   :  { %1842 = vmatprep.subr.bf16.mxu1 %v2000_v23  ;;  %v2002_v39 = vld [vmem:[%s2886_s2 + $0x18] sm:$0xff]   ;;  %v1980_v41 = vld [vmem:[%s2885_s0 + $0xa4] ss:$8 sps:$4 sm:$0xff]   ;;  %v2003_v42 = vld [vmem:[%s2886_s2 + $0x10] sm:$0xff]  }
   0xf   :  { %1685 = vmatpush3.bf16.msra.mxu0 %v1941_v7  ;;  %v1979_v40 = vld [vmem:[%s2885_s0 + $0x90] ss:$8 sps:$4 sm:$0xff]   ;;  %v2004_v43 = vld [vmem:[%s2886_s2 + $0x8] sm:$0xff]   ;;  %v1983_v45 = vld [vmem:[%s2885_s0 + $0xb4] ss:$8 sps:$4 sm:$0xff]  }
  0x10   :  { %1686 = vmatprep.subr.bf16.mxu0 %v1942_v8  ;;  %v1982_v44 = vld [vmem:[%s2885_s0 + $0xa0] ss:$8 sps:$4 sm:$0xff]   ;;  %v1985_v47 = vld [vmem:[%s2885_s0 + $0xb0] ss:$8 sps:$4 sm:$0xff]   ;;  %v1986_v48 = vld [vmem:[%s2885_s0 + $0xc4] ss:$8 sps:$4 sm:$0xff]  }
  0x11   :  { %1843 = vmatpush3.bf16.msra.mxu1 %v2000_v23  ;;  %v2005_v46 = vld [vmem:[%s2886_s2] sm:$0xff]   ;;  %v1989_v50 = vld [vmem:[%s2885_s0 + $0xd4] ss:$8 sps:$4 sm:$0xff]   ;;  %v1991_v51 = vld [vmem:[%s2885_s0 + $0xd0] ss:$8 sps:$4 sm:$0xff]  }
  0x12   :  { %1844 = vmatprep.subr.bf16.mxu1 %v2001_v25  ;;  %v1988_v49 = vld [vmem:[%s2885_s0 + $0xc0] ss:$8 sps:$4 sm:$0xff]   ;;  %v1992_v52 = vld [vmem:[%s2885_s0 + $0xe4] ss:$8 sps:$4 sm:$0xff]   ;;  %v1995_v54 = vld [vmem:[%s2885_s0 + $0xf4] ss:$8 sps:$4 sm:$0xff]  }
  0x13   :  { %1687 = vmatpush3.bf16.msra.mxu0 %v1943_v9  ;;  %v1994_v53 = vld [vmem:[%s2885_s0 + $0xe0] ss:$8 sps:$4 sm:$0xff]   ;;  %v1997_v55 = vld [vmem:[%s2885_s0 + $0xf0] ss:$8 sps:$4 sm:$0xff]  }
  0x14   :  { %1688 = vmatprep.subr.bf16.mxu0 %v1944_v10  ;;  %v2006_v59 = vld [vmem:[%s2887_s3 + $0x38] sm:$0xff]   ;;  %v2007_v8 = vld [vmem:[%s2887_s3 + $0x30] sm:$0xff]   ;;  %v2008_v11 = vld [vmem:[%s2887_s3 + $0x28] sm:$0xff]  }
  0x15   :  { %1845 = vmatpush3.bf16.msra.mxu1 %v2001_v25 }
  0x16   :  { %1846 = vmatprep.subr.bf16.mxu1 %v2002_v39 }
  0x17   :  { %1689 = vmatpush3.bf16.msra.mxu0 %v1945_v12 }
  0x18   :  { %1690 = vmatprep.subr.bf16.mxu0 %v1946_v13 }
  0x19   :  { %1847 = vmatpush3.bf16.msra.mxu1 %v2002_v39 }
  0x1a   :  { %1848 = vmatprep.subr.bf16.mxu1 %v2003_v42 }
  0x1b   :  { %1691 = vmatpush3.bf16.msra.mxu0 %v1947_v14 }
  0x1c   :  { %1692 = vmatprep.subr.bf16.mxu0 %v1948_v15 }
  0x1d   :  { %1849 = vmatpush3.bf16.msra.mxu1 %v2003_v42 }
  0x1e   :  { %1850 = vmatprep.subr.bf16.mxu1 %v2004_v43 }
  0x1f   :  { %1693 = vmatpush3.bf16.msra.mxu0 %v1949_v16 }
  0x21   :  { %1851 = vmatpush3.bf16.msra.mxu1 %v2004_v43 }
  0x22   :  { %442 = vmatmul.mubr.bf16.vlgmr.msra.gmra.mxu0 %v1950_v17  ;;  %1852 = vmatprep.subr.bf16.mxu1 %v2005_v46  ;;  %v2009_v17 = vld [vmem:[%s2887_s3 + $0x20] sm:$0xff]  }
  0x23   :  { %449 = vmatprep.mubr.bf16.mxu0 %v1953_v18 }
  0x25   :  { %1853 = vmatpush3.bf16.msra.mxu1 %v2005_v46 }
  0x26   :  { %1886 = vmatprep.subr.bf16.mxu1 %v2006_v59 }
  0x2a   :  { %450 = vmatmul.mubr.bf16.gmra.mxu0 %v1955_v19 }
  0x2b   :  { %457 = vmatprep.mubr.bf16.mxu0 %v1956_v20  ;;  %v2010_v20 = vld [vmem:[%s2887_s3 + $0x18] sm:$0xff]  }
  0x32   :  { %458 = vmatmul.mubr.bf16.gmra.mxu0 %v1958_v24 }
  0x33   :  { %465 = vmatprep.mubr.bf16.mxu0 %v1959_v26 }
  0x3a   :  { %466 = vmatmul.mubr.bf16.gmra.mxu0 %v1961_v27 }
  0x3b   :  { %473 = vmatprep.mubr.bf16.mxu0 %v1962_v28 }
  0x42   :  { %474 = vmatmul.mubr.bf16.gmra.mxu0 %v1964_v29 }
  0x43   :  { %481 = vmatprep.mubr.bf16.mxu0 %v1965_v30 }
  0x4a   :  { %482 = vmatmul.mubr.bf16.gmra.mxu0 %v1967_v31 }
  0x4b   :  { %489 = vmatprep.mubr.bf16.mxu0 %v1968_v32 }
  0x52   :  { %490 = vmatmul.mubr.bf16.gmra.mxu0 %v1970_v33 }
  0x53   :  { %497 = vmatprep.mubr.bf16.mxu0 %v1971_v34 }
  0x5a   :  { %498 = vmatmul.mubr.bf16.gmra.mxu0 %v1973_v35 }
  0x5b   :  { %505 = vmatprep.mubr.bf16.mxu0 %v1974_v36 }
  0x62   :  { %506 = vmatmul.mubr.bf16.gmra.mxu0 %v1976_v37 }
  0x63   :  { %513 = vmatprep.mubr.bf16.mxu0 %v1977_v38 }
  0x6a   :  { %514 = vmatmul.mubr.bf16.gmra.mxu0 %v1979_v40 }
  0x6b   :  { %521 = vmatprep.mubr.bf16.mxu0 %v1980_v41 }
  0x72   :  { %522 = vmatmul.mubr.bf16.gmra.mxu0 %v1982_v44 }
  0x73   :  { %529 = vmatprep.mubr.bf16.mxu0 %v1983_v45 }
  0x7a   :  { %530 = vmatmul.mubr.bf16.gmra.mxu0 %v1985_v47 }
  0x7b   :  { %537 = vmatprep.mubr.bf16.mxu0 %v1986_v48 }
  0x82   :  { %538 = vmatmul.mubr.bf16.gmra.mxu0 %v1988_v49 }
  0x83   :  { %545 = vmatprep.mubr.bf16.mxu0 %v1989_v50 }
  0x8a   :  { %546 = vmatmul.mubr.bf16.gmra.mxu0 %v1991_v51 }
  0x8b   :  { %553 = vmatprep.mubr.bf16.mxu0 %v1992_v52 }
  0x92   :  { %554 = vmatmul.mubr.bf16.gmra.mxu0 %v1994_v53 }
  0x93   :  { %561 = vmatprep.mubr.bf16.mxu0 %v1995_v54 }
  0x9a   :  { %562 = vmatmul.mubr.bf16.gmra.mxu0 %v1997_v55 }
  0xe2   :  { %v1694_v56 = vpop.f32.mrf.mxu0 }
  0xe4   :  { %v1695_v57 = vpop.f32.mrf.mxu0 }
  0xe5   :  { %v1696_v61 = vadd.f32 %v1695_v57, %v1694_v56 }
  0xe6   :  { %v1697_v58 = vpop.f32.mrf.mxu0 }
  0xe8   :  { %v1698_v60 = vpop.f32.mrf.mxu0 }
  0xe9   :  { %v1699_v62 = vadd.f32 %v1698_v60, %v1697_v58 }
  0xea   :  { %v1700_v63 = vpop.f32.mrf.mxu0 }
  0xeb   :  { %v669_v0 = vpack.c.bf16 %v1699_v62, %v1696_v61 }
  0xec   :  { %v1701_v1 = vpop.f32.mrf.mxu0 }
  0xed   :  { %1854 = vmatprep.mubr.bf16.mxu1 %v669_v0  ;;  %v1702_v4 = vadd.f32 %v1701_v1, %v1700_v63 }
  0xee   :  { %v1703_v2 = vpop.f32.mrf.mxu0 }
  0xf0   :  { %v1704_v3 = vpop.f32.mrf.mxu0 }
  0xf1   :  { %v1705_v5 = vadd.f32 %v1704_v3, %v1703_v2 }
  0xf2   :  { %v1706_v6 = vpop.f32.mrf.mxu0 }
  0xf3   :  { %v670_v7 = vpack.c.bf16 %v1705_v5, %v1702_v4  ;;  %v2011_v4 = vld [vmem:[%s2887_s3 + $0x10] sm:$0xff]  }
  0xf4   :  { %v1707_v9 = vpop.f32.mrf.mxu0 }
  0xf5   :  { %1855 = vmatmul.mubr.bf16.vlgmr.msra.gmra.mxu1 %v670_v7  ;;  %v1708_v13 = vadd.f32 %v1707_v9, %v1706_v6  ;;  %v2012_v7 = vld [vmem:[%s2887_s3 + $0x8] sm:$0xff]  }
  0xf6   :  { %v1709_v10 = vpop.f32.mrf.mxu0  ;;  %1887 = vmatpush3.bf16.msra.mxu1 %v2006_v59 }
  0xf7   :  { %1888 = vmatprep.subr.bf16.mxu1 %v2007_v8 }
  0xf8   :  { %v1710_v12 = vpop.f32.mrf.mxu0 }
  0xf9   :  { %v1711_v14 = vadd.f32 %v1710_v12, %v1709_v10 }
  0xfa   :  { %v1712_v15 = vpop.f32.mrf.mxu0  ;;  %1889 = vmatpush3.bf16.msra.mxu1 %v2007_v8 }
  0xfb   :  { %v671_v16 = vpack.c.bf16 %v1711_v14, %v1708_v13  ;;  %1890 = vmatprep.subr.bf16.mxu1 %v2008_v11  ;;  %v2013_v13 = vld [vmem:[%s2887_s3] sm:$0xff]  }
  0xfc   :  { %v1713_v18 = vpop.f32.mrf.mxu0 }
  0xfd   :  { %1858 = vmatprep.mubr.bf16.mxu1 %v671_v16  ;;  %v1714_v22 = vadd.f32 %v1713_v18, %v1712_v15 }
  0xfe   :  { %v1715_v19 = vpop.f32.mrf.mxu0  ;;  %1891 = vmatpush3.bf16.msra.mxu1 %v2008_v11 }
  0xff   :  { %1892 = vmatprep.subr.bf16.mxu1 %v2009_v17 }
 0x100   :  { %v1716_v21 = vpop.f32.mrf.mxu0 }
 0x101   :  { %v1717_v23 = vadd.f32 %v1716_v21, %v1715_v19 }
 0x102   :  { %v1718_v24 = vpop.f32.mrf.mxu0  ;;  %1893 = vmatpush3.bf16.msra.mxu1 %v2009_v17 }
 0x103   :  { %v672_v25 = vpack.c.bf16 %v1717_v23, %v1714_v22  ;;  %1894 = vmatprep.subr.bf16.mxu1 %v2010_v20 }
 0x104   :  { %v1719_v26 = vpop.f32.mrf.mxu0 }
 0x105   :  { %1859 = vmatmul.mubr.bf16.gmra.mxu1 %v672_v25  ;;  %v1720_v29 = vadd.f32 %v1719_v26, %v1718_v24 }
 0x106   :  { %v1721_v27 = vpop.f32.mrf.mxu0  ;;  %1895 = vmatpush3.bf16.msra.mxu1 %v2010_v20 }
 0x107   :  { %1896 = vmatprep.subr.bf16.mxu1 %v2011_v4 }
 0x108   :  { %v1722_v28 = vpop.f32.mrf.mxu0 }
 0x109   :  { %v1723_v30 = vadd.f32 %v1722_v28, %v1721_v27 }
 0x10a   :  { %v1724_v31 = vpop.f32.mrf.mxu0  ;;  %1897 = vmatpush3.bf16.msra.mxu1 %v2011_v4 }
 0x10b   :  { %v673_v32 = vpack.c.bf16 %v1723_v30, %v1720_v29  ;;  %1898 = vmatprep.subr.bf16.mxu1 %v2012_v7 }
 0x10c   :  { %v1725_v33 = vpop.f32.mrf.mxu0 }
 0x10d   :  { %1862 = vmatprep.mubr.bf16.mxu1 %v673_v32  ;;  %v1726_v36 = vadd.f32 %v1725_v33, %v1724_v31 }
 0x10e   :  { %v1727_v34 = vpop.f32.mrf.mxu0  ;;  %1899 = vmatpush3.bf16.msra.mxu1 %v2012_v7 }
 0x10f   :  { %1900 = vmatprep.subr.bf16.mxu1 %v2013_v13 }
 0x110   :  { %v1728_v35 = vpop.f32.mrf.mxu0 }
 0x111   :  { %v1729_v37 = vadd.f32 %v1728_v35, %v1727_v34 }
 0x112   :  { %v1730_v38 = vpop.f32.mrf.mxu0  ;;  %1901 = vmatpush3.bf16.msra.mxu1 %v2013_v13 }
 0x113   :  { %v674_v39 = vpack.c.bf16 %v1729_v37, %v1726_v36 }
 0x114   :  { %v1731_v40 = vpop.f32.mrf.mxu0 }
 0x115   :  { %1863 = vmatmul.mubr.bf16.gmra.mxu1 %v674_v39  ;;  %v1732_v43 = vadd.f32 %v1731_v40, %v1730_v38 }
 0x116   :  { %v1733_v41 = vpop.f32.mrf.mxu0 }
 0x118   :  { %v1734_v42 = vpop.f32.mrf.mxu0 }
 0x119   :  { %v1735_v44 = vadd.f32 %v1734_v42, %v1733_v41 }
 0x11a   :  { %v1736_v45 = vpop.f32.mrf.mxu0 }
 0x11b   :  { %v675_v46 = vpack.c.bf16 %v1735_v44, %v1732_v43 }
 0x11c   :  { %v1737_v47 = vpop.f32.mrf.mxu0 }
 0x11d   :  { %1866 = vmatprep.mubr.bf16.mxu1 %v675_v46  ;;  %v1738_v50 = vadd.f32 %v1737_v47, %v1736_v45 }
 0x11e   :  { %v1739_v48 = vpop.f32.mrf.mxu0 }
 0x120   :  { %v1740_v49 = vpop.f32.mrf.mxu0 }
 0x121   :  { %v1741_v51 = vadd.f32 %v1740_v49, %v1739_v48 }
 0x122   :  { %v1742_v52 = vpop.f32.mrf.mxu0 }
 0x123   :  { %v676_v53 = vpack.c.bf16 %v1741_v51, %v1738_v50 }
 0x124   :  { %v1743_v54 = vpop.f32.mrf.mxu0 }
 0x125   :  { %1867 = vmatmul.mubr.bf16.gmra.mxu1 %v676_v53  ;;  %v1744_v57 = vadd.f32 %v1743_v54, %v1742_v52 }
 0x126   :  { %v1745_v55 = vpop.f32.mrf.mxu0 }
 0x128   :  { %v1746_v56 = vpop.f32.mrf.mxu0 }
 0x129   :  { %v1747_v58 = vadd.f32 %v1746_v56, %v1745_v55 }
 0x12a   :  { %v1748_v59 = vpop.f32.mrf.mxu0 }
 0x12b   :  { %v677_v60 = vpack.c.bf16 %v1747_v58, %v1744_v57 }
 0x12c   :  { %v1749_v61 = vpop.f32.mrf.mxu0 }
 0x12d   :  { %1870 = vmatprep.mubr.bf16.mxu1 %v677_v60  ;;  %v1750_v0 = vadd.f32 %v1749_v61, %v1748_v59 }
 0x12e   :  { %v1751_v62 = vpop.f32.mrf.mxu0 }
 0x130   :  { %v1752_v63 = vpop.f32.mrf.mxu0 }
 0x131   :  { %v1753_v1 = vadd.f32 %v1752_v63, %v1751_v62 }
 0x132   :  { %v1754_v2 = vpop.f32.mrf.mxu0 }
 0x133   :  { %v678_v3 = vpack.c.bf16 %v1753_v1, %v1750_v0 }
 0x134   :  { %v1755_v5 = vpop.f32.mrf.mxu0 }
 0x135   :  { %1871 = vmatmul.mubr.bf16.gmra.mxu1 %v678_v3  ;;  %v1756_v9 = vadd.f32 %v1755_v5, %v1754_v2 }
 0x136   :  { %v1757_v6 = vpop.f32.mrf.mxu0 }
 0x138   :  { %v1758_v8 = vpop.f32.mrf.mxu0 }
 0x139   :  { %v1759_v10 = vadd.f32 %v1758_v8, %v1757_v6 }
 0x13a   :  { %v1760_v11 = vpop.f32.mrf.mxu0 }
 0x13b   :  { %v679_v12 = vpack.c.bf16 %v1759_v10, %v1756_v9 }
 0x13c   :  { %v1761_v14 = vpop.f32.mrf.mxu0 }
 0x13d   :  { %1874 = vmatprep.mubr.bf16.mxu1 %v679_v12  ;;  %v1762_v17 = vadd.f32 %v1761_v14, %v1760_v11 }
 0x13e   :  { %v1763_v15 = vpop.f32.mrf.mxu0 }
 0x140   :  { %v1764_v16 = vpop.f32.mrf.mxu0 }
 0x141   :  { %v1765_v18 = vadd.f32 %v1764_v16, %v1763_v15 }
 0x142   :  { %v1766_v19 = vpop.f32.mrf.mxu0 }
 0x143   :  { %v680_v20 = vpack.c.bf16 %v1765_v18, %v1762_v17 }
 0x144   :  { %v1767_v21 = vpop.f32.mrf.mxu0 }
 0x145   :  { %1875 = vmatmul.mubr.bf16.gmra.mxu1 %v680_v20  ;;  %v1768_v24 = vadd.f32 %v1767_v21, %v1766_v19 }
 0x146   :  { %v1769_v22 = vpop.f32.mrf.mxu0 }
 0x148   :  { %v1770_v23 = vpop.f32.mrf.mxu0 }
 0x149   :  { %v1771_v25 = vadd.f32 %v1770_v23, %v1769_v22 }
 0x14a   :  { %v1772_v26 = vpop.f32.mrf.mxu0 }
 0x14b   :  { %v681_v27 = vpack.c.bf16 %v1771_v25, %v1768_v24 }
 0x14c   :  { %v1773_v28 = vpop.f32.mrf.mxu0 }
 0x14d   :  { %1878 = vmatprep.mubr.bf16.mxu1 %v681_v27  ;;  %v1774_v31 = vadd.f32 %v1773_v28, %v1772_v26 }
 0x14e   :  { %v1775_v29 = vpop.f32.mrf.mxu0 }
 0x150   :  { %v1776_v30 = vpop.f32.mrf.mxu0 }
 0x151   :  { %v1777_v32 = vadd.f32 %v1776_v30, %v1775_v29 }
 0x152   :  { %v1778_v33 = vpop.f32.mrf.mxu0 }
 0x153   :  { %v682_v34 = vpack.c.bf16 %v1777_v32, %v1774_v31 }
 0x154   :  { %v1779_v35 = vpop.f32.mrf.mxu0 }
 0x155   :  { %1879 = vmatmul.mubr.bf16.gmra.mxu1 %v682_v34  ;;  %v1780_v38 = vadd.f32 %v1779_v35, %v1778_v33 }
 0x156   :  { %v1781_v36 = vpop.f32.mrf.mxu0 }
 0x158   :  { %v1782_v37 = vpop.f32.mrf.mxu0 }
 0x159   :  { %v1783_v39 = vadd.f32 %v1782_v37, %v1781_v36 }
 0x15a   :  { %v1784_v40 = vpop.f32.mrf.mxu0 }
 0x15b   :  { %v683_v41 = vpack.c.bf16 %v1783_v39, %v1780_v38 }
 0x15c   :  { %v1785_v42 = vpop.f32.mrf.mxu0 }
 0x15d   :  { %1882 = vmatprep.mubr.bf16.mxu1 %v683_v41  ;;  %v1786_v45 = vadd.f32 %v1785_v42, %v1784_v40 }
 0x15e   :  { %v1787_v43 = vpop.f32.mrf.mxu0 }
 0x160   :  { %v1788_v44 = vpop.f32.mrf.mxu0 }
 0x161   :  { %v1789_v46 = vadd.f32 %v1788_v44, %v1787_v43 }
 0x163   :  { %v684_v47 = vpack.c.bf16 %v1789_v46, %v1786_v45 }
 0x165   :  { %1883 = vmatmul.mubr.bf16.gmra.mxu1 %v684_v47 }
 0x1b5   :  { %v1856_v48 = vpop.f32.mrf.mxu1 }
 0x1b6   :  { %v912_v55 = vmax.f32 %v1856_v48, 0.0 }
 0x1b7   :  { %v783_v49 = vpop.f32.mrf.mxu1 }
 0x1b8   :  { %v910_v53 = vmax.f32 %v783_v49, 0.0 }
 0x1b9   :  { %v1857_v50 = vpop.f32.mrf.mxu1 }
 0x1ba   :  { %v913_v51 = vmax.f32 %v1857_v50, 0.0 }
 0x1bb   :  { %v786_v52 = vpop.f32.mrf.mxu1 }
 0x1bc   :  { %v911_v54 = vmax.f32 %v786_v52, 0.0  ;;  %v943_v57 = vpack.c.bf16 %v913_v51, %v912_v55 }
 0x1be   :  { %v942_v56 = vpack.c.bf16 %v911_v54, %v910_v53 }
 0x1c0   :  { %1902 = vmatprep.mubr.bf16.mxu1 %v942_v56 }
 0x1c1   :  { %1903 = vmatmul.mubr.bf16.vlgmr.msra.gmra.mxu1 %v943_v57 }
 0x1c5   :  { %v1860_v58 = vpop.f32.mrf.mxu1 }
 0x1c6   :  { %v916_v1 = vmax.f32 %v1860_v58, 0.0 }
 0x1c7   :  { %v799_v59 = vpop.f32.mrf.mxu1 }
 0x1c8   :  { %v914_v63 = vmax.f32 %v799_v59, 0.0 }
 0x1c9   :  { %v1861_v60 = vpop.f32.mrf.mxu1 }
 0x1ca   :  { %v917_v61 = vmax.f32 %v1861_v60, 0.0 }
 0x1cb   :  { %v802_v62 = vpop.f32.mrf.mxu1 }
 0x1cc   :  { %v915_v0 = vmax.f32 %v802_v62, 0.0  ;;  %v945_v3 = vpack.c.bf16 %v917_v61, %v916_v1 }
 0x1ce   :  { %v944_v2 = vpack.c.bf16 %v915_v0, %v914_v63  ;;  %v1190_v0 = vlaneseq }
 0x1d0   :  { %1906 = vmatprep.mubr.bf16.mxu1 %v944_v2  ;;  %v2364_v1 = vand.u32 127, %v1190_v0  ;;  %v2369_v2 = vld [vmem:[%s2888_s4] ss:$0 sm:$0xff] }
 0x1d1   :  { %1907 = vmatmul.mubr.bf16.gmra.mxu1 %v945_v3 }
 0x1d2   :  { %vm1192_vm0 = vcmp.lt.s32.totalorder %v2364_v1, 8 }
 0x1d5   :  { %v1864_v4 = vpop.f32.mrf.mxu1 }
 0x1d6   :  { %v920_v11 = vmax.f32 %v1864_v4, 0.0 }
 0x1d7   :  { %v815_v5 = vpop.f32.mrf.mxu1 }
 0x1d8   :  { %v918_v9 = vmax.f32 %v815_v5, 0.0 }
 0x1d9   :  { %v1865_v6 = vpop.f32.mrf.mxu1 }
 0x1da   :  { %v921_v7 = vmax.f32 %v1865_v6, 0.0 }
 0x1db   :  { %v818_v8 = vpop.f32.mrf.mxu1 }
 0x1dc   :  { %v919_v10 = vmax.f32 %v818_v8, 0.0  ;;  %v947_v13 = vpack.c.bf16 %v921_v7, %v920_v11 }
 0x1de   :  { %v946_v12 = vpack.c.bf16 %v919_v10, %v918_v9 }
 0x1e0   :  { %1910 = vmatprep.mubr.bf16.mxu1 %v946_v12 }
 0x1e1   :  { %1911 = vmatmul.mubr.bf16.gmra.mxu1 %v947_v13 }
 0x1e5   :  { %v1868_v14 = vpop.f32.mrf.mxu1 }
 0x1e6   :  { %v924_v21 = vmax.f32 %v1868_v14, 0.0 }
 0x1e7   :  { %v831_v15 = vpop.f32.mrf.mxu1 }
 0x1e8   :  { %v922_v19 = vmax.f32 %v831_v15, 0.0 }
 0x1e9   :  { %v1869_v16 = vpop.f32.mrf.mxu1 }
 0x1ea   :  { %v925_v17 = vmax.f32 %v1869_v16, 0.0 }
 0x1eb   :  { %v834_v18 = vpop.f32.mrf.mxu1 }
 0x1ec   :  { %v923_v20 = vmax.f32 %v834_v18, 0.0  ;;  %v949_v23 = vpack.c.bf16 %v925_v17, %v924_v21 }
 0x1ee   :  { %v948_v22 = vpack.c.bf16 %v923_v20, %v922_v19 }
 0x1f0   :  { %1914 = vmatprep.mubr.bf16.mxu1 %v948_v22 }
 0x1f1   :  { %1915 = vmatmul.mubr.bf16.gmra.mxu1 %v949_v23 }
 0x1f5   :  { %v1872_v24 = vpop.f32.mrf.mxu1 }
 0x1f6   :  { %v928_v31 = vmax.f32 %v1872_v24, 0.0 }
 0x1f7   :  { %v847_v25 = vpop.f32.mrf.mxu1 }
 0x1f8   :  { %v926_v29 = vmax.f32 %v847_v25, 0.0 }
 0x1f9   :  { %v1873_v26 = vpop.f32.mrf.mxu1 }
 0x1fa   :  { %v929_v27 = vmax.f32 %v1873_v26, 0.0 }
 0x1fb   :  { %v850_v28 = vpop.f32.mrf.mxu1 }
 0x1fc   :  { %v927_v30 = vmax.f32 %v850_v28, 0.0  ;;  %v951_v33 = vpack.c.bf16 %v929_v27, %v928_v31 }
 0x1fe   :  { %v950_v32 = vpack.c.bf16 %v927_v30, %v926_v29 }
 0x200   :  { %1918 = vmatprep.mubr.bf16.mxu1 %v950_v32 }
 0x201   :  { %1919 = vmatmul.mubr.bf16.gmra.mxu1 %v951_v33 }
 0x205   :  { %v1876_v34 = vpop.f32.mrf.mxu1 }
 0x206   :  { %v932_v41 = vmax.f32 %v1876_v34, 0.0 }
 0x207   :  { %v863_v35 = vpop.f32.mrf.mxu1 }
 0x208   :  { %v930_v39 = vmax.f32 %v863_v35, 0.0 }
 0x209   :  { %v1877_v36 = vpop.f32.mrf.mxu1 }
 0x20a   :  { %v933_v37 = vmax.f32 %v1877_v36, 0.0 }
 0x20b   :  { %v866_v38 = vpop.f32.mrf.mxu1 }
 0x20c   :  { %v931_v40 = vmax.f32 %v866_v38, 0.0  ;;  %v953_v43 = vpack.c.bf16 %v933_v37, %v932_v41 }
 0x20e   :  { %v952_v42 = vpack.c.bf16 %v931_v40, %v930_v39 }
 0x210   :  { %1922 = vmatprep.mubr.bf16.mxu1 %v952_v42 }
 0x211   :  { %1923 = vmatmul.mubr.bf16.gmra.mxu1 %v953_v43 }
 0x215   :  { %v1880_v44 = vpop.f32.mrf.mxu1 }
 0x216   :  { %v936_v51 = vmax.f32 %v1880_v44, 0.0 }
 0x217   :  { %v879_v45 = vpop.f32.mrf.mxu1 }
 0x218   :  { %v934_v49 = vmax.f32 %v879_v45, 0.0 }
 0x219   :  { %v1881_v46 = vpop.f32.mrf.mxu1 }
 0x21a   :  { %v937_v47 = vmax.f32 %v1881_v46, 0.0 }
 0x21b   :  { %v882_v48 = vpop.f32.mrf.mxu1 }
 0x21c   :  { %v935_v50 = vmax.f32 %v882_v48, 0.0  ;;  %v955_v53 = vpack.c.bf16 %v937_v47, %v936_v51 }
 0x21e   :  { %v954_v52 = vpack.c.bf16 %v935_v50, %v934_v49 }
 0x220   :  { %1926 = vmatprep.mubr.bf16.mxu1 %v954_v52 }
 0x221   :  { %1927 = vmatmul.mubr.bf16.gmra.mxu1 %v955_v53 }
 0x225   :  { %v1884_v54 = vpop.f32.mrf.mxu1 }
 0x226   :  { %v940_v61 = vmax.f32 %v1884_v54, 0.0 }
 0x227   :  { %v895_v55 = vpop.f32.mrf.mxu1 }
 0x228   :  { %v938_v59 = vmax.f32 %v895_v55, 0.0 }
 0x229   :  { %v1885_v56 = vpop.f32.mrf.mxu1 }
 0x22a   :  { %v941_v57 = vmax.f32 %v1885_v56, 0.0 }
 0x22b   :  { %v898_v58 = vpop.f32.mrf.mxu1 }
 0x22c   :  { %v939_v60 = vmax.f32 %v898_v58, 0.0  ;;  %v957_v63 = vpack.c.bf16 %v941_v57, %v940_v61 }
 0x22e   :  { %v956_v62 = vpack.c.bf16 %v939_v60, %v938_v59 }
 0x230   :  { %1930 = vmatprep.mubr.bf16.mxu1 %v956_v62 }
 0x231   :  { %1931 = vmatmul.mubr.bf16.gmra.mxu1 %v957_v63 }
 0x281   :  { %v1904_v3 = vpop.f32.mrf.mxu1 }
 0x282   :  { %v1072_v4 = vadd.f32 %v1904_v3, %v2369_v2 }
 0x283   :  { %v1063_v5 = vpop.f32.mrf.mxu1 }
 0x284   :  { %v1064_v6 = vadd.f32 %v2369_v2, %v1063_v5  ;;  %v2376_v7 = vsel %vm1192_vm0, %v1072_v4, -1e+30 }
 0x285   :  { %1229 = vmax.xlane.f32.xlu1 %v2376_v7  ;;  %v1905_v8 = vpop.f32.mrf.mxu1 }
 0x286   :  { %v1075_v9 = vadd.f32 %v1905_v8, %v2369_v2  ;;  %v2382_v10 = vsel %vm1192_vm0, %v1064_v6, -1e+30 }
 0x287   :  { %v1066_v11 = vpop.f32.mrf.mxu1  ;;  %1225 = vmax.xlane.f32.xlu0 %v2382_v10 }
 0x288   :  { %v1067_v12 = vadd.f32 %v2369_v2, %v1066_v11  ;;  %v2388_v13 = vsel %vm1192_vm0, %v1075_v9, -1e+30 }
 0x289   :  { %1231 = vmax.xlane.f32.xlu1 %v2388_v13 }
 0x28a   :  { %v2393_v14 = vsel %vm1192_vm0, %v1067_v12, -1e+30 }
 0x28b   :  { %1227 = vmax.xlane.f32.xlu0 %v2393_v14 }
 0x291   :  { %v1908_v15 = vpop.f32.mrf.mxu1 }
 0x292   :  { %v1088_v16 = vadd.f32 %v1908_v15, %v2369_v2 }
 0x293   :  { %v1079_v17 = vpop.f32.mrf.mxu1 }
 0x294   :  { %v1080_v18 = vadd.f32 %v2369_v2, %v1079_v17  ;;  %v2400_v19 = vsel %vm1192_vm0, %v1088_v16, -1e+30 }
 0x295   :  { %v1909_v20 = vpop.f32.mrf.mxu1  ;;  %1237 = vmax.xlane.f32.xlu0 %v2400_v19 }
 0x296   :  { %v1091_v21 = vadd.f32 %v1909_v20, %v2369_v2  ;;  %v2411_v25 = vsel %vm1192_vm0, %v1080_v18, -1e+30 }
 0x297   :  { %v1082_v22 = vpop.f32.mrf.mxu1 }
 0x298   :  { %v1083_v23 = vadd.f32 %v2369_v2, %v1082_v22  ;;  %v2407_v24 = vsel %vm1192_vm0, %v1091_v21, -1e+30 }
 0x299   :  { %1239 = vmax.xlane.f32.xlu1 %v2407_v24  ;;  %1233 = vmax.xlane.f32.xlu0 %v2411_v25 }
 0x29a   :  { %v2417_v26 = vsel %vm1192_vm0, %v1083_v23, -1e+30 }
 0x29d   :  { %1235 = vmax.xlane.f32.xlu1 %v2417_v26 }
 0x2a1   :  { %v1912_v27 = vpop.f32.mrf.mxu1 }
 0x2a2   :  { %v1104_v28 = vadd.f32 %v1912_v27, %v2369_v2 }
 0x2a3   :  { %v1095_v29 = vpop.f32.mrf.mxu1 }
 0x2a4   :  { %v1096_v30 = vadd.f32 %v2369_v2, %v1095_v29  ;;  %v2424_v31 = vsel %vm1192_vm0, %v1104_v28, -1e+30 }
 0x2a5   :  { %v1913_v32 = vpop.f32.mrf.mxu1  ;;  %1245 = vmax.xlane.f32.xlu0 %v2424_v31 }
 0x2a6   :  { %v1107_v33 = vadd.f32 %v1913_v32, %v2369_v2  ;;  %v2435_v37 = vsel %vm1192_vm0, %v1096_v30, -1e+30 }
 0x2a7   :  { %v1098_v34 = vpop.f32.mrf.mxu1 }
 0x2a8   :  { %v1099_v35 = vadd.f32 %v2369_v2, %v1098_v34  ;;  %v2431_v36 = vsel %vm1192_vm0, %v1107_v33, -1e+30 }
 0x2a9   :  { %1247 = vmax.xlane.f32.xlu1 %v2431_v36  ;;  %1241 = vmax.xlane.f32.xlu0 %v2435_v37 }
 0x2aa   :  { %v2441_v38 = vsel %vm1192_vm0, %v1099_v35, -1e+30 }
 0x2ad   :  { %1243 = vmax.xlane.f32.xlu1 %v2441_v38 }
 0x2b1   :  { %v1916_v39 = vpop.f32.mrf.mxu1 }
 0x2b2   :  { %v1120_v40 = vadd.f32 %v1916_v39, %v2369_v2 }
 0x2b3   :  { %v1111_v41 = vpop.f32.mrf.mxu1 }
 0x2b4   :  { %v1112_v42 = vadd.f32 %v2369_v2, %v1111_v41  ;;  %v2448_v43 = vsel %vm1192_vm0, %v1120_v40, -1e+30 }
 0x2b5   :  { %v1917_v44 = vpop.f32.mrf.mxu1  ;;  %1253 = vmax.xlane.f32.xlu0 %v2448_v43 }
 0x2b6   :  { %v1123_v45 = vadd.f32 %v1917_v44, %v2369_v2  ;;  %v2459_v49 = vsel %vm1192_vm0, %v1112_v42, -1e+30 }
 0x2b7   :  { %v1114_v46 = vpop.f32.mrf.mxu1 }
 0x2b8   :  { %v1115_v47 = vadd.f32 %v2369_v2, %v1114_v46  ;;  %v2455_v48 = vsel %vm1192_vm0, %v1123_v45, -1e+30 }
 0x2b9   :  { %1255 = vmax.xlane.f32.xlu1 %v2455_v48  ;;  %1249 = vmax.xlane.f32.xlu0 %v2459_v49 }
 0x2ba   :  { %v2465_v50 = vsel %vm1192_vm0, %v1115_v47, -1e+30 }
 0x2bd   :  { %1251 = vmax.xlane.f32.xlu1 %v2465_v50 }
 0x2c1   :  { %v1920_v51 = vpop.f32.mrf.mxu1 }
 0x2c2   :  { %v1136_v52 = vadd.f32 %v1920_v51, %v2369_v2 }
 0x2c3   :  { %v1127_v53 = vpop.f32.mrf.mxu1 }
 0x2c4   :  { %v1128_v54 = vadd.f32 %v2369_v2, %v1127_v53  ;;  %v2472_v55 = vsel %vm1192_vm0, %v1136_v52, -1e+30 }
 0x2c5   :  { %v1921_v56 = vpop.f32.mrf.mxu1  ;;  %1261 = vmax.xlane.f32.xlu0 %v2472_v55 }
 0x2c6   :  { %v1139_v57 = vadd.f32 %v1921_v56, %v2369_v2  ;;  %v2483_v61 = vsel %vm1192_vm0, %v1128_v54, -1e+30 }
 0x2c7   :  { %v1130_v58 = vpop.f32.mrf.mxu1 }
 0x2c8   :  { %v1131_v59 = vadd.f32 %v2369_v2, %v1130_v58  ;;  %v2479_v60 = vsel %vm1192_vm0, %v1139_v57, -1e+30 }
 0x2c9   :  { %1263 = vmax.xlane.f32.xlu1 %v2479_v60  ;;  %1257 = vmax.xlane.f32.xlu0 %v2483_v61 }
 0x2ca   :  { %v2489_v62 = vsel %vm1192_vm0, %v1131_v59, -1e+30 }
 0x2cd   :  { %1259 = vmax.xlane.f32.xlu1 %v2489_v62 }
 0x2d1   :  { %v1924_v63 = vpop.f32.mrf.mxu1 }
 0x2d2   :  { %v1152_v0 = vadd.f32 %v1924_v63, %v2369_v2 }
 0x2d3   :  { %v1143_v3 = vpop.f32.mrf.mxu1 }
 0x2d4   :  { %v1144_v4 = vadd.f32 %v2369_v2, %v1143_v3  ;;  %v2496_v5 = vsel %vm1192_vm0, %v1152_v0, -1e+30 }
 0x2d5   :  { %v1925_v6 = vpop.f32.mrf.mxu1  ;;  %1269 = vmax.xlane.f32.xlu0 %v2496_v5 }
 0x2d6   :  { %v1155_v8 = vadd.f32 %v1925_v6, %v2369_v2  ;;  %v2507_v15 = vsel %vm1192_vm0, %v1144_v4, -1e+30 }
 0x2d7   :  { %v1146_v9 = vpop.f32.mrf.mxu1 }
 0x2d8   :  { %v1147_v11 = vadd.f32 %v2369_v2, %v1146_v9  ;;  %v2503_v12 = vsel %vm1192_vm0, %v1155_v8, -1e+30 }
 0x2d9   :  { %1271 = vmax.xlane.f32.xlu1 %v2503_v12  ;;  %1265 = vmax.xlane.f32.xlu0 %v2507_v15 }
 0x2da   :  { %v2513_v16 = vsel %vm1192_vm0, %v1147_v11, -1e+30 }
 0x2dd   :  { %1267 = vmax.xlane.f32.xlu1 %v2513_v16 }
 0x2e1   :  { %v1928_v17 = vpop.f32.mrf.mxu1 }
 0x2e2   :  { %v1168_v18 = vadd.f32 %v1928_v17, %v2369_v2 }
 0x2e3   :  { %v1159_v20 = vpop.f32.mrf.mxu1 }
 0x2e4   :  { %v1160_v21 = vadd.f32 %v2369_v2, %v1159_v20  ;;  %v2520_v22 = vsel %vm1192_vm0, %v1168_v18, -1e+30 }
 0x2e5   :  { %v1929_v23 = vpop.f32.mrf.mxu1  ;;  %1277 = vmax.xlane.f32.xlu0 %v2520_v22 }
 0x2e6   :  { %v1171_v27 = vadd.f32 %v1929_v23, %v2369_v2  ;;  %v2531_v32 = vsel %vm1192_vm0, %v1160_v21, -1e+30 }
 0x2e7   :  { %v1162_v28 = vpop.f32.mrf.mxu1 }
 0x2e8   :  { %v1163_v29 = vadd.f32 %v2369_v2, %v1162_v28  ;;  %v2527_v30 = vsel %vm1192_vm0, %v1171_v27, -1e+30 }
 0x2e9   :  { %1279 = vmax.xlane.f32.xlu1 %v2527_v30  ;;  %1273 = vmax.xlane.f32.xlu0 %v2531_v32 }
 0x2ea   :  { %v2537_v33 = vsel %vm1192_vm0, %v1163_v29, -1e+30 }
 0x2ed   :  { %1275 = vmax.xlane.f32.xlu1 %v2537_v33 }
 0x2f1   :  { %v1932_v34 = vpop.f32.mrf.mxu1 }
 0x2f2   :  { %v1184_v41 = vadd.f32 %v1932_v34, %v2369_v2 }
 0x2f3   :  { %v1175_v35 = vpop.f32.mrf.mxu1 }
 0x2f4   :  { %v1176_v39 = vadd.f32 %v2369_v2, %v1175_v35  ;;  %v2555_v51 = vsel %vm1192_vm0, %v1184_v41, -1e+30 }
 0x2f5   :  { %v1933_v40 = vpop.f32.mrf.mxu1 }
 0x2f6   :  { %v2544_v42 = vsel %vm1192_vm0, %v1176_v39, -1e+30  ;;  %v1187_v46 = vadd.f32 %v1933_v40, %v2369_v2 }
 0x2f7   :  { %v1178_v44 = vpop.f32.mrf.mxu1  ;;  %1281 = vmax.xlane.f32.xlu0 %v2544_v42 }
 0x2f8   :  { %v1179_v45 = vadd.f32 %v2369_v2, %v1178_v44  ;;  %v2561_v52 = vsel %vm1192_vm0, %v1187_v46, -1e+30 }
 0x2fa   :  { %v2551_v47 = vsel %vm1192_vm0, %v1179_v45, -1e+30 }
 0x2fb   :  { %1283 = vmax.xlane.f32.xlu1 %v2551_v47  ;;  %1285 = vmax.xlane.f32.xlu0 %v2555_v51 }
 0x2ff   :  { %1287 = vmax.xlane.f32.xlu1 %v2561_v52 }
 0x30e   :  { %v1230_v53 = vpop.xlane.xlu1 %1229 }
 0x30f   :  { %v2565_v2 = vsub.f32 %v2376_v7, %v1230_v53 }
 0x310   :  { %v1226_v54 = vpop.xlane.xlu0 %1225 }
 0x311   :  { %v1325_v56 = vmul.f32 1.442695, %v2565_v2  ;;  %v2569_v57 = vsub.f32 %v2382_v10, %v1226_v54 }
 0x312   :  { %v1232_v58 = vpop.xlane.xlu1 %1231 }
 0x313   :  { %2014 = vpow2.f32 %v1325_v56  ;;  %v1321_v59 = vmul.f32 1.442695, %v2569_v57  ;;  %v2573_v63 = vsub.f32 %v2388_v13, %v1232_v58 }
 0x314   :  { %v1228_v0 = vpop.xlane.xlu0 %1227 }
 0x315   :  { %2016 = vpow2.f32 %v1321_v59  ;;  %v1327_v3 = vmul.f32 1.442695, %v2573_v63  ;;  %v2577_v7 = vsub.f32 %v2393_v14, %v1228_v0 }
 0x317   :  { %2018 = vpow2.f32 %v1327_v3  ;;  %v1323_v4 = vmul.f32 1.442695, %v2577_v7 }
 0x319   :  { %2020 = vpow2.f32 %v1323_v4 }
 0x31e   :  { %v1238_v10 = vpop.xlane.xlu0 %1237 }
 0x31f   :  { %v2581_v6 = vsub.f32 %v2400_v19, %v1238_v10 }
 0x320   :  { %v2015_v8 = vpop.eup %2014 }
 0x321   :  { %v1333_v9 = vmul.f32 1.442695, %v2581_v6  ;;  %v1387_v13 = vsel %vm1192_vm0, %v2015_v8, 0.0 }
 0x322   :  { %v2017_v11 = vpop.eup %2016  ;;  %v1240_v17 = vpop.xlane.xlu1 %1239  ;;  %1421 = vadd.xlane.f32.xlu0 %v1387_v13 }
 0x323   :  { %v1234_v18 = vpop.xlane.xlu0 %1233  ;;  %2022 = vpow2.f32 %v1333_v9  ;;  %v2587_v14 = vsub.f32 %v2407_v24, %v1240_v17  ;;  %v1385_v28 = vsel %vm1192_vm0, %v2017_v11, 0.0 }
 0x324   :  { %v2590_v20 = vsub.f32 %v2411_v25, %v1234_v18  ;;  %v2019_v21 = vpop.eup %2018 }
 0x325   :  { %v1335_v19 = vmul.f32 1.442695, %v2587_v14  ;;  %v1388_v27 = vsel %vm1192_vm0, %v2019_v21, 0.0 }
 0x326   :  { %v1329_v23 = vmul.f32 1.442695, %v2590_v20  ;;  %v2021_v29 = vpop.eup %2020  ;;  %v1236_v34 = vpop.xlane.xlu1 %1235  ;;  %1423 = vadd.xlane.f32.xlu1 %v1388_v27  ;;  %1417 = vadd.xlane.f32.xlu0 %v1385_v28 }
 0x327   :  { %2024 = vpow2.f32 %v1335_v19  ;;  %v2599_v24 = vsub.f32 %v2417_v26, %v1236_v34  ;;  %v1386_v35 = vsel %vm1192_vm0, %v2021_v29, 0.0 }
 0x328   :  { %2026 = vpow2.f32 %v1329_v23 }
 0x329   :  { %v1331_v25 = vmul.f32 1.442695, %v2599_v24 }
 0x32a   :  { %1419 = vadd.xlane.f32.xlu1 %v1386_v35 }
 0x32b   :  { %2028 = vpow2.f32 %v1331_v25 }
 0x32e   :  { %v1246_v39 = vpop.xlane.xlu0 %1245 }
 0x32f   :  { %v2605_v40 = vsub.f32 %v2424_v31, %v1246_v39 }
 0x330   :  { %v2023_v41 = vpop.eup %2022 }
 0x331   :  { %v1341_v44 = vmul.f32 1.442695, %v2605_v40  ;;  %v1391_v45 = vsel %vm1192_vm0, %v2023_v41, 0.0 }
 0x332   :  { %v1248_v26 = vpop.xlane.xlu1 %1247  ;;  %v1242_v46 = vpop.xlane.xlu0 %1241  ;;  %1429 = vadd.xlane.f32.xlu0 %v1391_v45 }
 0x333   :  { %2030 = vpow2.f32 %v1341_v44  ;;  %v2611_v53 = vsub.f32 %v2431_v36, %v1248_v26  ;;  %v2614_v54 = vsub.f32 %v2435_v37, %v1242_v46 }
 0x334   :  { %v2025_v56 = vpop.eup %2024 }
 0x335   :  { %v2027_v58 = vpop.eup %2026  ;;  %v1343_v31 = vmul.f32 1.442695, %v2611_v53  ;;  %v1337_v59 = vmul.f32 1.442695, %v2614_v54  ;;  %v1392_v0 = vsel %vm1192_vm0, %v2025_v56, 0.0 }
 0x336   :  { %v1244_v3 = vpop.xlane.xlu1 %1243  ;;  %1431 = vadd.xlane.f32.xlu1 %v1392_v0  ;;  %v1389_v4 = vsel %vm1192_vm0, %v2027_v58, 0.0 }
 0x337   :  { %2032 = vpow2.f32 %v1343_v31  ;;  %v2623_v36 = vsub.f32 %v2441_v38, %v1244_v3  ;;  %1425 = vadd.xlane.f32.xlu0 %v1389_v4 }
 0x338   :  { %v2029_v37 = vpop.eup %2028  ;;  %2034 = vpow2.f32 %v1337_v59 }
 0x339   :  { %v1339_v10 = vmul.f32 1.442695, %v2623_v36  ;;  %v1390_v8 = vsel %vm1192_vm0, %v2029_v37, 0.0 }
 0x33a   :  { %1427 = vadd.xlane.f32.xlu1 %v1390_v8 }
 0x33b   :  { %2036 = vpow2.f32 %v1339_v10 }
 0x33e   :  { %v1254_v9 = vpop.xlane.xlu0 %1253 }
 0x33f   :  { %v2629_v13 = vsub.f32 %v2448_v43, %v1254_v9 }
 0x340   :  { %v2031_v11 = vpop.eup %2030 }
 0x341   :  { %v1349_v17 = vmul.f32 1.442695, %v2629_v13  ;;  %v1395_v38 = vsel %vm1192_vm0, %v2031_v11, 0.0 }
 0x342   :  { %v1256_v18 = vpop.xlane.xlu1 %1255  ;;  %v1250_v21 = vpop.xlane.xlu0 %1249  ;;  %1437 = vadd.xlane.f32.xlu0 %v1395_v38 }
 0x343   :  { %2038 = vpow2.f32 %v1349_v17  ;;  %v2635_v19 = vsub.f32 %v2455_v48, %v1256_v18  ;;  %v2638_v23 = vsub.f32 %v2459_v49, %v1250_v21 }
 0x344   :  { %v2033_v27 = vpop.eup %2032 }
 0x345   :  { %v2035_v28 = vpop.eup %2034  ;;  %v1351_v43 = vmul.f32 1.442695, %v2635_v19  ;;  %v1345_v29 = vmul.f32 1.442695, %v2638_v23  ;;  %v1396_v34 = vsel %vm1192_vm0, %v2033_v27, 0.0 }
 0x346   :  { %v1252_v25 = vpop.xlane.xlu1 %1251  ;;  %1439 = vadd.xlane.f32.xlu1 %v1396_v34  ;;  %v1393_v35 = vsel %vm1192_vm0, %v2035_v28, 0.0 }
 0x347   :  { %2040 = vpow2.f32 %v1351_v43  ;;  %v2647_v48 = vsub.f32 %v2465_v50, %v1252_v25  ;;  %1433 = vadd.xlane.f32.xlu0 %v1393_v35 }
 0x348   :  { %v2037_v49 = vpop.eup %2036  ;;  %2042 = vpow2.f32 %v1345_v29 }
 0x349   :  { %v1347_v39 = vmul.f32 1.442695, %v2647_v48  ;;  %v1394_v41 = vsel %vm1192_vm0, %v2037_v49, 0.0 }
 0x34a   :  { %1435 = vadd.xlane.f32.xlu1 %v1394_v41 }
 0x34b   :  { %2044 = vpow2.f32 %v1347_v39 }
 0x34e   :  { %v1262_v44 = vpop.xlane.xlu0 %1261 }
 0x34f   :  { %v2653_v45 = vsub.f32 %v2472_v55, %v1262_v44 }
 0x350   :  { %v2039_v26 = vpop.eup %2038 }
 0x351   :  { %v1357_v46 = vmul.f32 1.442695, %v2653_v45  ;;  %v1399_v50 = vsel %vm1192_vm0, %v2039_v26, 0.0 }
 0x352   :  { %v1264_v56 = vpop.xlane.xlu1 %1263  ;;  %v1258_v58 = vpop.xlane.xlu0 %1257  ;;  %1445 = vadd.xlane.f32.xlu0 %v1399_v50 }
 0x353   :  { %2046 = vpow2.f32 %v1357_v46  ;;  %v2659_v31 = vsub.f32 %v2479_v60, %v1264_v56  ;;  %v2662_v59 = vsub.f32 %v2483_v61, %v1258_v58 }
 0x354   :  { %v2041_v0 = vpop.eup %2040 }
 0x355   :  { %v2043_v3 = vpop.eup %2042  ;;  %v1359_v55 = vmul.f32 1.442695, %v2659_v31  ;;  %v1353_v4 = vmul.f32 1.442695, %v2662_v59  ;;  %v1400_v37 = vsel %vm1192_vm0, %v2041_v0, 0.0 }
 0x356   :  { %v1260_v10 = vpop.xlane.xlu1 %1259  ;;  %1447 = vadd.xlane.f32.xlu1 %v1400_v37  ;;  %v1397_v8 = vsel %vm1192_vm0, %v2043_v3, 0.0 }
 0x357   :  { %2048 = vpow2.f32 %v1359_v55  ;;  %v2671_v60 = vsub.f32 %v2489_v62, %v1260_v10  ;;  %1441 = vadd.xlane.f32.xlu0 %v1397_v8 }
 0x358   :  { %v2045_v61 = vpop.eup %2044  ;;  %2050 = vpow2.f32 %v1353_v4 }
 0x359   :  { %v1355_v9 = vmul.f32 1.442695, %v2671_v60  ;;  %v1398_v11 = vsel %vm1192_vm0, %v2045_v61, 0.0 }
 0x35a   :  { %1443 = vadd.xlane.f32.xlu1 %v1398_v11 }
 0x35b   :  { %2052 = vpow2.f32 %v1355_v9 }
 0x35e   :  { %v1270_v17 = vpop.xlane.xlu0 %1269 }
 0x35f   :  { %v2677_v38 = vsub.f32 %v2496_v5, %v1270_v17 }
 0x360   :  { %v2047_v18 = vpop.eup %2046 }
 0x361   :  { %v1365_v21 = vmul.f32 1.442695, %v2677_v38  ;;  %v1403_v62 = vsel %vm1192_vm0, %v2047_v18, 0.0 }
 0x362   :  { %v1272_v27 = vpop.xlane.xlu1 %1271  ;;  %v1266_v28 = vpop.xlane.xlu0 %1265  ;;  %1453 = vadd.xlane.f32.xlu0 %v1403_v62 }
 0x363   :  { %2054 = vpow2.f32 %v1365_v21  ;;  %v2683_v43 = vsub.f32 %v2503_v12, %v1272_v27  ;;  %v2686_v29 = vsub.f32 %v2507_v15, %v1266_v28 }
 0x364   :  { %v2049_v34 = vpop.eup %2048 }
 0x365   :  { %v2051_v25 = vpop.eup %2050  ;;  %v1367_v5 = vmul.f32 1.442695, %v2683_v43  ;;  %v1361_v35 = vmul.f32 1.442695, %v2686_v29  ;;  %v1404_v49 = vsel %vm1192_vm0, %v2049_v34, 0.0 }
 0x366   :  { %v1268_v39 = vpop.xlane.xlu1 %1267  ;;  %1455 = vadd.xlane.f32.xlu1 %v1404_v49  ;;  %v1401_v41 = vsel %vm1192_vm0, %v2051_v25, 0.0 }
 0x367   :  { %2056 = vpow2.f32 %v1367_v5  ;;  %v2695_v12 = vsub.f32 %v2513_v16, %v1268_v39  ;;  %1449 = vadd.xlane.f32.xlu0 %v1401_v41 }
 0x368   :  { %v2053_v15 = vpop.eup %2052  ;;  %2058 = vpow2.f32 %v1361_v35 }
 0x369   :  { %v1363_v44 = vmul.f32 1.442695, %v2695_v12  ;;  %v1402_v26 = vsel %vm1192_vm0, %v2053_v15, 0.0 }
 0x36a   :  { %1451 = vadd.xlane.f32.xlu1 %v1402_v26 }
 0x36b   :  { %2060 = vpow2.f32 %v1363_v44 }
 0x36e   :  { %v1278_v46 = vpop.xlane.xlu0 %1277 }
 0x36f   :  { %v2701_v50 = vsub.f32 %v2520_v22, %v1278_v46 }
 0x370   :  { %v2055_v56 = vpop.eup %2054 }
 0x371   :  { %v1373_v58 = vmul.f32 1.442695, %v2701_v50  ;;  %v1407_v16 = vsel %vm1192_vm0, %v2055_v56, 0.0 }
 0x372   :  { %v1280_v0 = vpop.xlane.xlu1 %1279  ;;  %v1274_v3 = vpop.xlane.xlu0 %1273  ;;  %1461 = vadd.xlane.f32.xlu0 %v1407_v16 }
 0x373   :  { %2062 = vpow2.f32 %v1373_v58  ;;  %v2707_v55 = vsub.f32 %v2527_v30, %v1280_v0  ;;  %v2710_v4 = vsub.f32 %v2531_v32, %v1274_v3 }
 0x374   :  { %v2057_v37 = vpop.eup %2056 }
 0x375   :  { %v2059_v10 = vpop.eup %2058  ;;  %v1375_v22 = vmul.f32 1.442695, %v2707_v55  ;;  %v1369_v8 = vmul.f32 1.442695, %v2710_v4  ;;  %v1408_v61 = vsel %vm1192_vm0, %v2057_v37, 0.0 }
 0x376   :  { %v1276_v9 = vpop.xlane.xlu1 %1275  ;;  %1463 = vadd.xlane.f32.xlu1 %v1408_v61  ;;  %v1405_v11 = vsel %vm1192_vm0, %v2059_v10, 0.0 }
 0x377   :  { %2064 = vpow2.f32 %v1375_v22  ;;  %v2719_v30 = vsub.f32 %v2537_v33, %v1276_v9  ;;  %1457 = vadd.xlane.f32.xlu0 %v1405_v11 }
 0x378   :  { %v2061_v32 = vpop.eup %2060  ;;  %2066 = vpow2.f32 %v1369_v8 }
 0x379   :  { %v1371_v17 = vmul.f32 1.442695, %v2719_v30  ;;  %v1406_v18 = vsel %vm1192_vm0, %v2061_v32, 0.0 }
 0x37a   :  { %1459 = vadd.xlane.f32.xlu1 %v1406_v18 }
 0x37b   :  { %2068 = vpow2.f32 %v1371_v17 }
 0x380   :  { %v2063_v21 = vpop.eup %2062  ;;  %v1282_v62 = vpop.xlane.xlu0 %1281 }
 0x381   :  { %v2725_v27 = vsub.f32 %v2544_v42, %v1282_v62  ;;  %v1411_v28 = vsel %vm1192_vm0, %v2063_v21, 0.0 }
 0x382   :  { %1469 = vadd.xlane.f32.xlu0 %v1411_v28 }
 0x383   :  { %v1377_v33 = vmul.f32 1.442695, %v2725_v27 }
 0x384   :  { %v2065_v34 = vpop.eup %2064  ;;  %v1284_v25 = vpop.xlane.xlu1 %1283 }
 0x385   :  { %v1286_v5 = vpop.xlane.xlu0 %1285  ;;  %v2067_v35 = vpop.eup %2066  ;;  %2070 = vpow2.f32 %v1377_v33  ;;  %v2731_v49 = vsub.f32 %v2551_v47, %v1284_v25  ;;  %v1412_v42 = vsel %vm1192_vm0, %v2065_v34, 0.0 }
 0x386   :  { %v2734_v39 = vsub.f32 %v2555_v51, %v1286_v5  ;;  %1471 = vadd.xlane.f32.xlu1 %v1412_v42  ;;  %v1409_v41 = vsel %vm1192_vm0, %v2067_v35, 0.0 }
 0x387   :  { %v1379_v15 = vmul.f32 1.442695, %v2731_v49  ;;  %1465 = vadd.xlane.f32.xlu0 %v1409_v41 }
 0x388   :  { %v1381_v44 = vmul.f32 1.442695, %v2734_v39  ;;  %v2069_v26 = vpop.eup %2068  ;;  %v1288_v46 = vpop.xlane.xlu1 %1287 }
 0x389   :  { %2072 = vpow2.f32 %v1379_v15  ;;  %v2743_v47 = vsub.f32 %v2561_v52, %v1288_v46  ;;  %v1410_v51 = vsel %vm1192_vm0, %v2069_v26, 0.0 }
 0x38a   :  { %2074 = vpow2.f32 %v1381_v44  ;;  %1467 = vadd.xlane.f32.xlu1 %v1410_v51 }
 0x38b   :  { %v1383_v56 = vmul.f32 1.442695, %v2743_v47 }
 0x38d   :  { %2076 = vpow2.f32 %v1383_v56 }
 0x392   :  { %v2071_v58 = vpop.eup %2070 }
 0x393   :  { %v1413_v16 = vsel %vm1192_vm0, %v2071_v58, 0.0 }
 0x394   :  { %1473 = vadd.xlane.f32.xlu0 %v1413_v16 }
 0x396   :  { %v2073_v0 = vpop.eup %2072 }
 0x397   :  { %v2075_v3 = vpop.eup %2074  ;;  %v1414_v37 = vsel %vm1192_vm0, %v2073_v0, 0.0 }
 0x398   :  { %1475 = vadd.xlane.f32.xlu1 %v1414_v37  ;;  %v1415_v52 = vsel %vm1192_vm0, %v2075_v3, 0.0 }
 0x399   :  { %1477 = vadd.xlane.f32.xlu0 %v1415_v52 }
 0x39a   :  { %v2077_v10 = vpop.eup %2076 }
 0x39b   :  { %v1416_v22 = vsel %vm1192_vm0, %v2077_v10, 0.0 }
 0x39c   :  { %1479 = vadd.xlane.f32.xlu1 %v1416_v22 }
 0x3ab   :  { %v1422_v8 = vpop.xlane.xlu0 %1421 }
 0x3ac   :  { %2078 = vlog2.f32 %v1422_v8 }
 0x3af   :  { %v1424_v61 = vpop.xlane.xlu1 %1423  ;;  %v1418_v9 = vpop.xlane.xlu0 %1417 }
 0x3b0   :  { %2080 = vlog2.f32 %v1424_v61 }
 0x3b1   :  { %2082 = vlog2.f32 %v1418_v9 }
 0x3b3   :  { %v1420_v11 = vpop.xlane.xlu1 %1419 }
 0x3b4   :  { %2084 = vlog2.f32 %v1420_v11 }
 0x3b9   :  { %v2079_v32 = vpop.eup %2078 }
 0x3ba   :  { %v1486_v17 = vmul.f32 0.6931472, %v2079_v32 }
 0x3bb   :  { %v1430_v18 = vpop.xlane.xlu0 %1429 }
 0x3bc   :  { %v1547_v21 = vsub.f32 %v2565_v2, %v1486_v17  ;;  %2086 = vlog2.f32 %v1430_v18 }
 0x3bd   :  { %v2081_v62 = vpop.eup %2080 }
 0x3be   :  { %v2083_v28 = vpop.eup %2082  ;;  %1579 = vst [vmem:[%s2889_s5 + $0x10] sm:$0xff] %v1547_v21  ;;  %v1488_v1 = vmul.f32 0.6931472, %v2081_v62 }
 0x3bf   :  { %v1482_v33 = vmul.f32 0.6931472, %v2083_v28  ;;  %v1432_v34 = vpop.xlane.xlu1 %1431 }
 0x3c0   :  { %v1548_v25 = vsub.f32 %v2573_v63, %v1488_v1  ;;  %2088 = vlog2.f32 %v1432_v34  ;;  %v1426_v5 = vpop.xlane.xlu0 %1425 }
 0x3c1   :  { %v2085_v35 = vpop.eup %2084  ;;  %v1545_v42 = vsub.f32 %v2569_v57, %v1482_v33  ;;  %2090 = vlog2.f32 %v1426_v5 }
 0x3c2   :  { %1580 = vst [vmem:[%s2889_s5 + $0x18] sm:$0xff] %v1548_v25  ;;  %v1484_v2 = vmul.f32 0.6931472, %v2085_v35 }
 0x3c3   :  { %1577 = vst [vmem:[%s2889_s5] sm:$0xff] %v1545_v42  ;;  %v1428_v41 = vpop.xlane.xlu1 %1427 }
 0x3c4   :  { %v1546_v15 = vsub.f32 %v2577_v7, %v1484_v2  ;;  %2092 = vlog2.f32 %v1428_v41 }
 0x3c6   :  { %1578 = vst [vmem:[%s2889_s5 + $0x8] sm:$0xff] %v1546_v15 }
 0x3c9   :  { %v2087_v63 = vpop.eup %2086 }
 0x3ca   :  { %v1494_v57 = vmul.f32 0.6931472, %v2087_v63 }
 0x3cb   :  { %v1438_v44 = vpop.xlane.xlu0 %1437 }
 0x3cc   :  { %v1551_v26 = vsub.f32 %v2581_v6, %v1494_v57  ;;  %2094 = vlog2.f32 %v1438_v44 }
 0x3cd   :  { %v2089_v46 = vpop.eup %2088 }
 0x3ce   :  { %v2091_v51 = vpop.eup %2090  ;;  %1583 = vst [vmem:[%s2889_s5 + $0x30] sm:$0xff] %v1551_v26  ;;  %v1496_v56 = vmul.f32 0.6931472, %v2089_v46 }
 0x3cf   :  { %v1490_v58 = vmul.f32 0.6931472, %v2091_v51  ;;  %v1440_v7 = vpop.xlane.xlu1 %1439 }
 0x3d0   :  { %v1552_v16 = vsub.f32 %v2587_v14, %v1496_v56  ;;  %2096 = vlog2.f32 %v1440_v7  ;;  %v1434_v0 = vpop.xlane.xlu0 %1433 }
 0x3d1   :  { %v2093_v3 = vpop.eup %2092  ;;  %v1549_v37 = vsub.f32 %v2590_v20, %v1490_v58  ;;  %2098 = vlog2.f32 %v1434_v0 }
 0x3d2   :  { %1584 = vst [vmem:[%s2889_s5 + $0x38] sm:$0xff] %v1552_v16  ;;  %v1492_v6 = vmul.f32 0.6931472, %v2093_v3 }
 0x3d3   :  { %1581 = vst [vmem:[%s2889_s5 + $0x20] sm:$0xff] %v1549_v37  ;;  %v1436_v52 = vpop.xlane.xlu1 %1435 }
 0x3d4   :  { %v1550_v10 = vsub.f32 %v2599_v24, %v1492_v6  ;;  %2100 = vlog2.f32 %v1436_v52 }
 0x3d6   :  { %1582 = vst [vmem:[%s2889_s5 + $0x28] sm:$0xff] %v1550_v10 }
 0x3d9   :  { %v2095_v14 = vpop.eup %2094 }
 0x3da   :  { %v1502_v20 = vmul.f32 0.6931472, %v2095_v14 }
 0x3db   :  { %v1446_v22 = vpop.xlane.xlu0 %1445 }
 0x3dc   :  { %v1555_v8 = vsub.f32 %v2605_v40, %v1502_v20  ;;  %2102 = vlog2.f32 %v1446_v22 }
 0x3dd   :  { %v2097_v61 = vpop.eup %2096 }
 0x3de   :  { %v2099_v9 = vpop.eup %2098  ;;  %1587 = vst [vmem:[%s2889_s5 + $0x50] sm:$0xff] %v1555_v8  ;;  %v1504_v11 = vmul.f32 0.6931472, %v2097_v61 }
 0x3df   :  { %v1498_v32 = vmul.f32 0.6931472, %v2099_v9  ;;  %v1448_v24 = vpop.xlane.xlu1 %1447 }
 0x3e0   :  { %v1556_v17 = vsub.f32 %v2611_v53, %v1504_v11  ;;  %2104 = vlog2.f32 %v1448_v24  ;;  %v1442_v18 = vpop.xlane.xlu0 %1441 }
 0x3e1   :  { %v2101_v21 = vpop.eup %2100  ;;  %v1553_v62 = vsub.f32 %v2614_v54, %v1498_v32  ;;  %2106 = vlog2.f32 %v1442_v18 }
 0x3e2   :  { %1588 = vst [vmem:[%s2889_s5 + $0x58] sm:$0xff] %v1556_v17  ;;  %v1500_v40 = vmul.f32 0.6931472, %v2101_v21 }
 0x3e3   :  { %1585 = vst [vmem:[%s2889_s5 + $0x40] sm:$0xff] %v1553_v62  ;;  %v1444_v28 = vpop.xlane.xlu1 %1443 }
 0x3e4   :  { %v1554_v1 = vsub.f32 %v2623_v36, %v1500_v40  ;;  %2108 = vlog2.f32 %v1444_v28 }
 0x3e6   :  { %1586 = vst [vmem:[%s2889_s5 + $0x48] sm:$0xff] %v1554_v1 }
 0x3e9   :  { %v2103_v53 = vpop.eup %2102 }
 0x3ea   :  { %v1510_v54 = vmul.f32 0.6931472, %v2103_v53 }
 0x3eb   :  { %v1454_v33 = vpop.xlane.xlu0 %1453 }
 0x3ec   :  { %v1559_v34 = vsub.f32 %v2629_v13, %v1510_v54  ;;  %2110 = vlog2.f32 %v1454_v33 }
 0x3ed   :  { %v2105_v25 = vpop.eup %2104 }
 0x3ee   :  { %v2107_v5 = vpop.eup %2106  ;;  %1591 = vst [vmem:[%s2889_s5 + $0x70] sm:$0xff] %v1559_v34  ;;  %v1512_v35 = vmul.f32 0.6931472, %v2105_v25 }
 0x3ef   :  { %v1506_v42 = vmul.f32 0.6931472, %v2107_v5  ;;  %v1456_v36 = vpop.xlane.xlu1 %1455 }
 0x3f0   :  { %v1560_v2 = vsub.f32 %v2635_v19, %v1512_v35  ;;  %2112 = vlog2.f32 %v1456_v36  ;;  %v1450_v41 = vpop.xlane.xlu0 %1449 }
 0x3f1   :  { %v2109_v15 = vpop.eup %2108  ;;  %v1557_v63 = vsub.f32 %v2638_v23, %v1506_v42  ;;  %2114 = vlog2.f32 %v1450_v41 }
 0x3f2   :  { %1592 = vst [vmem:[%s2889_s5 + $0x78] sm:$0xff] %v1560_v2  ;;  %v1508_v13 = vmul.f32 0.6931472, %v2109_v15 }
 0x3f3   :  { %1589 = vst [vmem:[%s2889_s5 + $0x60] sm:$0xff] %v1557_v63  ;;  %v1452_v57 = vpop.xlane.xlu1 %1451 }
 0x3f4   :  { %v1558_v44 = vsub.f32 %v2647_v48, %v1508_v13  ;;  %2116 = vlog2.f32 %v1452_v57 }
 0x3f6   :  { %1590 = vst [vmem:[%s2889_s5 + $0x68] sm:$0xff] %v1558_v44 }
 0x3f9   :  { %v2111_v19 = vpop.eup %2110 }
 0x3fa   :  { %v1518_v23 = vmul.f32 0.6931472, %v2111_v19 }
 0x3fb   :  { %v1462_v26 = vpop.xlane.xlu0 %1461 }
 0x3fc   :  { %v1563_v46 = vsub.f32 %v2653_v45, %v1518_v23  ;;  %2118 = vlog2.f32 %v1462_v26 }
 0x3fd   :  { %v2113_v51 = vpop.eup %2112 }
 0x3fe   :  { %v2115_v56 = vpop.eup %2114  ;;  %1595 = vst [vmem:[%s2889_s5 + $0x90] sm:$0xff] %v1563_v46  ;;  %v1520_v58 = vmul.f32 0.6931472, %v2113_v51 }
 0x3ff   :  { %v1514_v7 = vmul.f32 0.6931472, %v2115_v56  ;;  %v1464_v48 = vpop.xlane.xlu1 %1463 }
 0x400   :  { %v1564_v16 = vsub.f32 %v2659_v31, %v1520_v58  ;;  %2120 = vlog2.f32 %v1464_v48  ;;  %v1458_v0 = vpop.xlane.xlu0 %1457 }
 0x401   :  { %v2117_v3 = vpop.eup %2116  ;;  %v1561_v37 = vsub.f32 %v2662_v59, %v1514_v7  ;;  %2122 = vlog2.f32 %v1458_v0 }
 0x402   :  { %1596 = vst [vmem:[%s2889_s5 + $0x98] sm:$0xff] %v1564_v16  ;;  %v1516_v45 = vmul.f32 0.6931472, %v2117_v3 }
 0x403   :  { %1593 = vst [vmem:[%s2889_s5 + $0x80] sm:$0xff] %v1561_v37  ;;  %v1460_v6 = vpop.xlane.xlu1 %1459 }
 0x404   :  { %v1562_v52 = vsub.f32 %v2671_v60, %v1516_v45  ;;  %2124 = vlog2.f32 %v1460_v6 }
 0x406   :  { %1594 = vst [vmem:[%s2889_s5 + $0x88] sm:$0xff] %v1562_v52 }
 0x409   :  { %v2119_v31 = vpop.eup %2118 }
 0x40a   :  { %v1526_v59 = vmul.f32 0.6931472, %v2119_v31 }
 0x40b   :  { %v1470_v10 = vpop.xlane.xlu0 %1469 }
 0x40c   :  { %v1567_v14 = vsub.f32 %v2677_v38, %v1526_v59  ;;  %2126 = vlog2.f32 %v1470_v10 }
 0x40d   :  { %v2121_v20 = vpop.eup %2120 }
 0x40e   :  { %v2123_v22 = vpop.eup %2122  ;;  %1599 = vst [vmem:[%s2889_s5 + $0xb0] sm:$0xff] %v1567_v14  ;;  %v1528_v8 = vmul.f32 0.6931472, %v2121_v20 }
 0x40f   :  { %v1522_v61 = vmul.f32 0.6931472, %v2123_v22  ;;  %v1472_v60 = vpop.xlane.xlu1 %1471 }
 0x410   :  { %v1568_v9 = vsub.f32 %v2683_v43, %v1528_v8  ;;  %2128 = vlog2.f32 %v1472_v60  ;;  %v1466_v11 = vpop.xlane.xlu0 %1465 }
 0x411   :  { %v2125_v32 = vpop.eup %2124  ;;  %v1565_v24 = vsub.f32 %v2686_v29, %v1522_v61  ;;  %2130 = vlog2.f32 %v1466_v11 }
 0x412   :  { %1600 = vst [vmem:[%s2889_s5 + $0xb8] sm:$0xff] %v1568_v9  ;;  %v1524_v38 = vmul.f32 0.6931472, %v2125_v32 }
 0x413   :  { %1597 = vst [vmem:[%s2889_s5 + $0xa0] sm:$0xff] %v1565_v24  ;;  %v1468_v17 = vpop.xlane.xlu1 %1467 }
 0x414   :  { %v1566_v18 = vsub.f32 %v2695_v12, %v1524_v38  ;;  %2132 = vlog2.f32 %v1468_v17 }
 0x416   :  { %1598 = vst [vmem:[%s2889_s5 + $0xa8] sm:$0xff] %v1566_v18 }
 0x419   :  { %v2127_v43 = vpop.eup %2126 }
 0x41a   :  { %v1534_v29 = vmul.f32 0.6931472, %v2127_v43 }
 0x41c   :  { %v1571_v21 = vsub.f32 %v2701_v50, %v1534_v29 }
 0x41d   :  { %v2129_v62 = vpop.eup %2128  ;;  %v1474_v40 = vpop.xlane.xlu0 %1473 }
 0x41e   :  { %v2131_v28 = vpop.eup %2130  ;;  %1603 = vst [vmem:[%s2889_s5 + $0xd0] sm:$0xff] %v1571_v21  ;;  %v1536_v1 = vmul.f32 0.6931472, %v2129_v62  ;;  %2134 = vlog2.f32 %v1474_v40 }
 0x41f   :  { %v1530_v53 = vmul.f32 0.6931472, %v2131_v28 }
 0x420   :  { %v1572_v12 = vsub.f32 %v2707_v55, %v1536_v1 }
 0x421   :  { %v2133_v54 = vpop.eup %2132  ;;  %v1569_v33 = vsub.f32 %v2710_v4, %v1530_v53  ;;  %v1476_v34 = vpop.xlane.xlu1 %1475 }
 0x422   :  { %1604 = vst [vmem:[%s2889_s5 + $0xd8] sm:$0xff] %v1572_v12  ;;  %v1532_v50 = vmul.f32 0.6931472, %v2133_v54  ;;  %2136 = vlog2.f32 %v1476_v34  ;;  %v1478_v25 = vpop.xlane.xlu0 %1477 }
 0x423   :  { %1601 = vst [vmem:[%s2889_s5 + $0xc0] sm:$0xff] %v1569_v33  ;;  %2138 = vlog2.f32 %v1478_v25 }
 0x424   :  { %v1570_v5 = vsub.f32 %v2719_v30, %v1532_v50 }
 0x425   :  { %v1480_v35 = vpop.xlane.xlu1 %1479 }
 0x426   :  { %1602 = vst [vmem:[%s2889_s5 + $0xc8] sm:$0xff] %v1570_v5  ;;  %2140 = vlog2.f32 %v1480_v35 }
 0x42b   :  { %v2135_v55 = vpop.eup %2134 }
 0x42c   :  { %v1538_v4 = vmul.f32 0.6931472, %v2135_v55 }
 0x42e   :  { %v1573_v42 = vsub.f32 %v2725_v27, %v1538_v4 }
 0x42f   :  { %v2137_v36 = vpop.eup %2136 }
 0x430   :  { %v2139_v2 = vpop.eup %2138  ;;  %1605 = vst [vmem:[%s2889_s5 + $0xe0] sm:$0xff] %v1573_v42  ;;  %v1540_v41 = vmul.f32 0.6931472, %v2137_v36 }
 0x431   :  { %v1542_v15 = vmul.f32 0.6931472, %v2139_v2 }
 0x432   :  { %v1574_v30 = vsub.f32 %v2731_v49, %v1540_v41 }
 0x433   :  { %v2141_v63 = vpop.eup %2140  ;;  %v1575_v13 = vsub.f32 %v2734_v39, %v1542_v15 }
 0x434   :  { %1606 = vst [vmem:[%s2889_s5 + $0xe8] sm:$0xff] %v1574_v30  ;;  %v1544_v57 = vmul.f32 0.6931472, %v2141_v63 }
 0x435   :  { %1607 = vst [vmem:[%s2889_s5 + $0xf0] sm:$0xff] %v1575_v13 }
 0x436   :  { %v1576_v27 = vsub.f32 %v2743_v47, %v1544_v57 }
 0x438   :  { %1608 = vst [vmem:[%s2889_s5 + $0xf8] sm:$0xff] %v1576_v27 }

</bundles_post_ra>
